<compile_context>
chip_gen: v7x
topology: tpu7x:2x2x1
jax: 0.10.0
libtpu: 0.0.40
codegen_flags: <defaults>
</compile_context>

<pallas_src>
import jax
import jax.numpy as jnp
from jax.experimental import pallas as pl
from jax.experimental.pallas import tpu as pltpu

IN_FEATURES = 600
HIDDEN1 = 512
HIDDEN2 = 256
NUM_CLASSES = 100

TILE_B_MAX = 256   # batch rows per grid step; fills MXU M and fits VMEM on v5e/v6e/v7x


def mlp_kernel(x_ref, w1_ref, b1_ref, w2_ref, b2_ref, w3_ref, b3_ref, o_ref):
    """Fused 3-layer MLP on one batch tile: bf16 MXU matmuls, f32 accumulation."""
    # In-kernel cast: x arrives f32, VPU cast to bf16 is hidden under the tile DMA.
    x = x_ref[...].astype(jnp.bfloat16)

    # Layer 1: (TILE_B, 600) @ (600, 512) + b1
    h = jnp.dot(x, w1_ref[...], preferred_element_type=jnp.float32) + b1_ref[...]
    h = h.astype(jnp.bfloat16)

    # Layer 2: (TILE_B, 512) @ (512, 256) + b2
    h = jnp.dot(h, w2_ref[...], preferred_element_type=jnp.float32) + b2_ref[...]
    h = h.astype(jnp.bfloat16)

    # Layer 3: (TILE_B, 256) @ (256, 100) + b3
    out = jnp.dot(h, w3_ref[...], preferred_element_type=jnp.float32) + b3_ref[...]
    o_ref[...] = out.astype(o_ref.dtype)


def prepare_params(params):
    """Cast weights to bf16 (done once, outside the hot path)."""
    (w1, b1), (w2, b2), (w3, b3) = params
    return (w1.astype(jnp.bfloat16), b1,
            w2.astype(jnp.bfloat16), b2,
            w3.astype(jnp.bfloat16), b3)


def _round_up(x, m):
    return ((x + m - 1) // m) * m


def _vmem_limit_bytes(tile_b):
    weight_bytes = (IN_FEATURES * HIDDEN1 + HIDDEN1 * HIDDEN2
                    + HIDDEN2 * NUM_CLASSES) * 2               # bf16 weights
    bias_bytes = (HIDDEN1 + HIDDEN2 + NUM_CLASSES) * 4         # f32 biases
    tile_bytes = tile_b * (IN_FEATURES * 4 + NUM_CLASSES * 4)  # f32 x tile + out tile
    # Pipeline may double-buffer everything; 2x extra headroom for compiler scratch
    # and layout padding.  Always well under v7x's 64 MiB physical VMEM.
    footprint = 2 * (weight_bytes + bias_bytes) + 2 * tile_bytes
    return int(min(64 << 20, max(4 << 20, 2 * footprint)))


@jax.jit
def nn_forward(x, prepared):
    """x: (B, 600) f32.  prepared: output of prepare_params().  Returns (B, 100) f32."""
    w1, b1, w2, b2, w3, b3 = prepared
    B = x.shape[0]

    # Tile the batch: single tile (rounded up to a sublane multiple) for small B,
    # TILE_B_MAX-sized tiles for large B.  Pad batch rows with zeros; sliced off after.
    tile_b = min(TILE_B_MAX, _round_up(max(B, 8), 8))
    b_pad = _round_up(B, tile_b)
    if b_pad != B:
        x = jnp.pad(x, ((0, b_pad - B), (0, 0)))
    n_tiles = b_pad // tile_b

    grid_spec = pltpu.PrefetchScalarGridSpec(
        num_scalar_prefetch=0,
        grid=(n_tiles,),
        in_specs=[
            pl.BlockSpec((tile_b, IN_FEATURES), lambda i: (i, 0)),   # x tile
            pl.BlockSpec((IN_FEATURES, HIDDEN1), lambda i: (0, 0)),  # w1 (resident)
            pl.BlockSpec((1, HIDDEN1), lambda i: (0, 0)),            # b1
            pl.BlockSpec((HIDDEN1, HIDDEN2), lambda i: (0, 0)),      # w2 (resident)
            pl.BlockSpec((1, HIDDEN2), lambda i: (0, 0)),            # b2
            pl.BlockSpec((HIDDEN2, NUM_CLASSES), lambda i: (0, 0)),  # w3 (resident)
            pl.BlockSpec((1, NUM_CLASSES), lambda i: (0, 0)),        # b3
        ],
        out_specs=pl.BlockSpec((tile_b, NUM_CLASSES), lambda i: (i, 0)),
    )

    out = pl.pallas_call(
        mlp_kernel,
        out_shape=jax.ShapeDtypeStruct((b_pad, NUM_CLASSES), jnp.float32),
        grid_spec=grid_spec,
        compiler_params=pltpu.CompilerParams(
            dimension_semantics=("parallel",),       # batch tiles -> both v7x TCs
            vmem_limit_bytes=_vmem_limit_bytes(tile_b),
        ),
    )(x, w1, b1, w2, b2, w3, b3)

    return out[:B] if b_pad != B else out


def init_params(key, dims):
    """PyTorch-style uniform init U(-1/sqrt(fan_in), 1/sqrt(fan_in)).

    Weights stored as (in_features, out_features) == transpose of nn.Linear.weight.
    """
    params = []
    for d_in, d_out in zip(dims[:-1], dims[1:]):
        key, kw, kb = jax.random.split(key, 3)
        bound = 1.0 / jnp.sqrt(d_in)
        w = jax.random.uniform(kw, (d_in, d_out), jnp.float32, -bound, bound)
        b = jax.random.uniform(kb, (1, d_out), jnp.float32, -bound, bound)
        params.append((w, b))
    return params


if __name__ == "__main__":
    key = jax.random.PRNGKey(0)
    k_x, k_p = jax.random.split(key)

    # Moderate batch that exercises the batch grid (2 tiles of 256) and the
    # pad-to-tile / slice-back path, while staying small.
    B = 500
    dims = (IN_FEATURES, HIDDEN1, HIDDEN2, NUM_CLASSES)

    params = init_params(k_p, dims)
    prepared = prepare_params(params)
    x = jax.random.normal(k_x, (B, IN_FEATURES), jnp.float32)

    out = nn_forward(x, prepared)
    out = jax.block_until_ready(out)

    # Reference: plain f32 JAX, same math as the PyTorch module.
    ref = x
    for w, b in params:
        ref = ref @ w + b

    assert out.shape == (B, NUM_CLASSES)
    # bf16 weights/activations -> relaxed tolerance vs the f32 reference.
    assert jnp.allclose(out, ref, atol=3e-2, rtol=3e-2), (
        float(jnp.max(jnp.abs(out - ref))))

    print("KERNEL_OK")
</pallas_src>

<mosaic_0001>
module attributes {stable_mosaic.version = 11 : i64} {
  func.func @mlp_kernel(%arg0: i32, %arg1: memref<256x600xf32, #tpu.memory_space<vmem>>, %arg2: memref<600x512xbf16, #tpu.memory_space<vmem>>, %arg3: memref<1x512xf32, #tpu.memory_space<vmem>>, %arg4: memref<512x256xbf16, #tpu.memory_space<vmem>>, %arg5: memref<1x256xf32, #tpu.memory_space<vmem>>, %arg6: memref<256x100xbf16, #tpu.memory_space<vmem>>, %arg7: memref<1x100xf32, #tpu.memory_space<vmem>>, %arg8: memref<256x100xf32, #tpu.memory_space<vmem>>) attributes {dimension_semantics = [#tpu.dimension_semantics<parallel>], iteration_bounds = array<i64: 2>, scalar_prefetch = 0 : i64, scratch_operands = 0 : i64, tpu.core_type = #tpu.core_type<tc>, window_params = [{transform_indices = @transform_0, window_bounds = array<i64: 256, 600>}, {pipeline_mode = #tpu.pipeline_mode<synchronous>, transform_indices = @transform_1, window_bounds = array<i64: 600, 512>}, {pipeline_mode = #tpu.pipeline_mode<synchronous>, transform_indices = @transform_2, window_bounds = array<i64: 1, 512>}, {pipeline_mode = #tpu.pipeline_mode<synchronous>, transform_indices = @transform_3, window_bounds = array<i64: 512, 256>}, {pipeline_mode = #tpu.pipeline_mode<synchronous>, transform_indices = @transform_4, window_bounds = array<i64: 1, 256>}, {pipeline_mode = #tpu.pipeline_mode<synchronous>, transform_indices = @transform_5, window_bounds = array<i64: 256, 100>}, {pipeline_mode = #tpu.pipeline_mode<synchronous>, transform_indices = @transform_6, window_bounds = array<i64: 1, 100>}, {transform_indices = @transform_7, window_bounds = array<i64: 256, 100>}]} {
    %c0 = arith.constant 0 : index
    %c0_0 = arith.constant 0 : index
    %0 = vector.load %arg1[%c0, %c0_0] : memref<256x600xf32, #tpu.memory_space<vmem>>, vector<256x600xf32>
    %1 = arith.truncf %0 : vector<256x600xf32> to vector<256x600xbf16>
    %c0_1 = arith.constant 0 : index
    %c0_2 = arith.constant 0 : index
    %2 = vector.load %arg2[%c0_1, %c0_2] : memref<600x512xbf16, #tpu.memory_space<vmem>>, vector<600x512xbf16>
    %cst = arith.constant dense<0.000000e+00> : vector<256x512xf32>
    %3 = tpu.matmul %1, %2, %cst {dimension_numbers = #tpu.dot_dimension_numbers<[1], [0], [0], [1], [0, 0, 1, 1], [], []>} : vector<256x600xbf16>, vector<600x512xbf16>, vector<256x512xf32> -> vector<256x512xf32>
    %c0_3 = arith.constant 0 : index
    %c0_4 = arith.constant 0 : index
    %4 = vector.load %arg3[%c0_3, %c0_4] : memref<1x512xf32, #tpu.memory_space<vmem>>, vector<1x512xf32>
    %5 = vector.broadcast %4 : vector<1x512xf32> to vector<256x512xf32>
    %6 = arith.addf %3, %5 : vector<256x512xf32>
    %7 = arith.truncf %6 : vector<256x512xf32> to vector<256x512xbf16>
    %c0_5 = arith.constant 0 : index
    %c0_6 = arith.constant 0 : index
    %8 = vector.load %arg4[%c0_5, %c0_6] : memref<512x256xbf16, #tpu.memory_space<vmem>>, vector<512x256xbf16>
    %cst_7 = arith.constant dense<0.000000e+00> : vector<256x256xf32>
    %9 = tpu.matmul %7, %8, %cst_7 {dimension_numbers = #tpu.dot_dimension_numbers<[1], [0], [0], [1], [0, 0, 1, 1], [], []>} : vector<256x512xbf16>, vector<512x256xbf16>, vector<256x256xf32> -> vector<256x256xf32>
    %c0_8 = arith.constant 0 : index
    %c0_9 = arith.constant 0 : index
    %10 = vector.load %arg5[%c0_8, %c0_9] : memref<1x256xf32, #tpu.memory_space<vmem>>, vector<1x256xf32>
    %11 = vector.broadcast %10 : vector<1x256xf32> to vector<256x256xf32>
    %12 = arith.addf %9, %11 : vector<256x256xf32>
    %13 = arith.truncf %12 : vector<256x256xf32> to vector<256x256xbf16>
    %c0_10 = arith.constant 0 : index
    %c0_11 = arith.constant 0 : index
    %14 = vector.load %arg6[%c0_10, %c0_11] : memref<256x100xbf16, #tpu.memory_space<vmem>>, vector<256x100xbf16>
    %cst_12 = arith.constant dense<0.000000e+00> : vector<256x100xf32>
    %15 = tpu.matmul %13, %14, %cst_12 {dimension_numbers = #tpu.dot_dimension_numbers<[1], [0], [0], [1], [0, 0, 1, 1], [], []>} : vector<256x256xbf16>, vector<256x100xbf16>, vector<256x100xf32> -> vector<256x100xf32>
    %c0_13 = arith.constant 0 : index
    %c0_14 = arith.constant 0 : index
    %16 = vector.load %arg7[%c0_13, %c0_14] : memref<1x100xf32, #tpu.memory_space<vmem>>, vector<1x100xf32>
    %17 = vector.broadcast %16 : vector<1x100xf32> to vector<256x100xf32>
    %18 = arith.addf %15, %17 : vector<256x100xf32>
    %c0_15 = arith.constant 0 : index
    %c0_16 = arith.constant 0 : index
    %19 = vector.load %arg8[%c0_15, %c0_16] : memref<256x100xf32, #tpu.memory_space<vmem>>, vector<256x100xf32>
    tpu.vector_store %arg8[%c0_15, %c0_16], %18 {strides = array<i32>} : memref<256x100xf32, #tpu.memory_space<vmem>>, vector<256x100xf32>,
    return
  }
  func.func @transform_0(%arg0: i32) -> (i32, i32) {
    %c0_i32 = arith.constant 0 : i32
    %c0_i32_0 = arith.constant 0 : i32
    return %arg0, %c0_i32 : i32, i32
  }
  func.func @transform_1(%arg0: i32) -> (i32, i32) {
    %c0_i32 = arith.constant 0 : i32
    %c0_i32_0 = arith.constant 0 : i32
    %c0_i32_1 = arith.constant 0 : i32
    return %c0_i32, %c0_i32_0 : i32, i32
  }
  func.func @transform_2(%arg0: i32) -> (i32, i32) {
    %c0_i32 = arith.constant 0 : i32
    %c0_i32_0 = arith.constant 0 : i32
    %c0_i32_1 = arith.constant 0 : i32
    return %c0_i32, %c0_i32_0 : i32, i32
  }
  func.func @transform_3(%arg0: i32) -> (i32, i32) {
    %c0_i32 = arith.constant 0 : i32
    %c0_i32_0 = arith.constant 0 : i32
    %c0_i32_1 = arith.constant 0 : i32
    return %c0_i32, %c0_i32_0 : i32, i32
  }
  func.func @transform_4(%arg0: i32) -> (i32, i32) {
    %c0_i32 = arith.constant 0 : i32
    %c0_i32_0 = arith.constant 0 : i32
    %c0_i32_1 = arith.constant 0 : i32
    return %c0_i32, %c0_i32_0 : i32, i32
  }
  func.func @transform_5(%arg0: i32) -> (i32, i32) {
    %c0_i32 = arith.constant 0 : i32
    %c0_i32_0 = arith.constant 0 : i32
    %c0_i32_1 = arith.constant 0 : i32
    return %c0_i32, %c0_i32_0 : i32, i32
  }
  func.func @transform_6(%arg0: i32) -> (i32, i32) {
    %c0_i32 = arith.constant 0 : i32
    %c0_i32_0 = arith.constant 0 : i32
    %c0_i32_1 = arith.constant 0 : i32
    return %c0_i32, %c0_i32_0 : i32, i32
  }
  func.func @transform_7(%arg0: i32) -> (i32, i32) {
    %c0_i32 = arith.constant 0 : i32
    %c0_i32_0 = arith.constant 0 : i32
    return %arg0, %c0_i32 : i32, i32
  }
}

</mosaic_0001>

<bundles_post_ra>
// kernel: nn_forward.1
= control target key start
LH: loop header
LB: loop body
LE: loop exit
PB: predicated region body
PF: predicated region fallthrough
CT: control target
= control target key end

     0   :  { %s5262_s24 = smov 0   ;;  %s6952_s0 = inlined_call_operand.vmem [shape: f32[512,600], index: 0, kind: input, shape index: {}]   ;;  %s6953_s1 = inlined_call_operand.vmem [shape: bf16[600,512], index: 1, kind: input, shape index: {}]   ;;  %s6954_s2 = inlined_call_operand.vmem [shape: f32[1,512], index: 2, kind: input, shape index: {}]   ;;  %s6955_s3 = inlined_call_operand.vmem [shape: bf16[512,256], index: 3, kind: input, shape index: {}]   ;;  %s6956_s4 = inlined_call_operand.vmem [shape: f32[1,256], index: 4, kind: input, shape index: {}]   ;;  %s6957_s5 = inlined_call_operand.vmem [shape: bf16[256,100], index: 5, kind: input, shape index: {}]   ;;  %s6958_s6 = inlined_call_operand.vmem [shape: f32[1,100], index: 6, kind: input, shape index: {}]   ;;  %s6959_s7 = inlined_call_operand.vmem [shape: f32[512,100], index: 7, kind: output, shape index: {}]  }
   0x1 LB: > { %s3931_s25 = sadd.s32 4294967295, %s5219_s24   ;;  %p3935_p0 = scmp.ge.s32.totalorder %s5219_s24, 1  ;;  %s5219_s24 = sphi %s5262_s24, %s17_s24  }
   0x2   : > { %p239_p1 = scmp.lt.s32.totalorder %s5219_s24, 3 }
   0x4   : > { %p240_p2 = pnand %p3935_p0, %p239_p1 }
   0x5   : > { %v4875_v0 = vld [vmem:[%s6953_s1 + $0x4] ss:$16 sps:$4 sm:$0xff] (!%p240_p2)   ;;  %v4877_v1 = vld [vmem:[%s6953_s1] ss:$16 sps:$4 sm:$0xff] (!%p240_p2)   ;;  %s3936_s11 = sshll.u32 (!%p240_p2), %s3931_s25, 5  ;;  %vm1497_vm0 = vcmask (!%p240_p2), 1043456  }
   0x6   : > { %243 = sbr.rel (%p240_p2) target bundleno = 1170 (0x492), region = 48  ;;  %1510 = vmatprep.subr.bf16.mxu0 (!%p240_p2), %v4875_v0  ;;  %4321 = vmatprep.subr.bf16.mxu1 (!%p240_p2), %v4875_v0  ;;  %v4878_v2 = vld [vmem:[%s6953_s1 + $0x24] ss:$16 sps:$4 sm:$0xff] (!%p240_p2)   ;;  %v4880_v3 = vld [vmem:[%s6953_s1 + $0x20] ss:$16 sps:$4 sm:$0xff] (!%p240_p2)   ;;  %p273_p3 = scmp.lt.s32.totalorder (!%p240_p2), %s3936_s11, 63 }
   0x7   : > { %1511 = vmatpush1.bf16.msra.mxu0 (!%p240_p2), %v4877_v1  ;;  %4337 = vmatpush1.bf16.msra.mxu1 (!%p240_p2), %v4877_v1  ;;  %v4881_v4 = vld [vmem:[%s6953_s1 + $0x44] ss:$16 sps:$4 sm:$0xff] (!%p240_p2)   ;;  %v4883_v5 = vld [vmem:[%s6953_s1 + $0x40] ss:$16 sps:$4 sm:$0xff] (!%p240_p2)   ;;  %v4928_v43 = vld [vmem:[%s6953_s1 + $0xc] ss:$16 sps:$4 sm:$0xff] (!%p240_p2)  }
   0x8   : > { %1512 = vmatprep.subr.bf16.mxu0 (!%p240_p2), %v4878_v2  ;;  %4322 = vmatprep.subr.bf16.mxu1 (!%p240_p2), %v4878_v2  ;;  %v4884_v6 = vld [vmem:[%s6953_s1 + $0x64] ss:$16 sps:$4 sm:$0xff] (!%p240_p2)   ;;  %v4886_v7 = vld [vmem:[%s6953_s1 + $0x60] ss:$16 sps:$4 sm:$0xff] (!%p240_p2)   ;;  %v4926_v51 = vld [vmem:[%s6953_s1 + $0x8] ss:$16 sps:$4 sm:$0xff] (!%p240_p2)  }
   0x9   : > { %v4887_v8 = vld [vmem:[%s6953_s1 + $0x84] ss:$16 sps:$4 sm:$0xff] (!%p240_p2)   ;;  %v4889_v9 = vld [vmem:[%s6953_s1 + $0x80] ss:$16 sps:$4 sm:$0xff] (!%p240_p2)   ;;  %v4934_v53 = vld [vmem:[%s6953_s1 + $0x2c] ss:$16 sps:$4 sm:$0xff] (!%p240_p2)  }
   0xa   : > { %v4890_v10 = vld [vmem:[%s6953_s1 + $0xa4] ss:$16 sps:$4 sm:$0xff] (!%p240_p2)   ;;  %v4892_v11 = vld [vmem:[%s6953_s1 + $0xa0] ss:$16 sps:$4 sm:$0xff] (!%p240_p2)   ;;  %v4932_v55 = vld [vmem:[%s6953_s1 + $0x28] ss:$16 sps:$4 sm:$0xff] (!%p240_p2)  }
   0xb   : > { %1513 = vmatpush1.bf16.msra.mxu0 (!%p240_p2), %v4880_v3  ;;  %4338 = vmatpush1.bf16.msra.mxu1 (!%p240_p2), %v4880_v3  ;;  %v4893_v12 = vld [vmem:[%s6953_s1 + $0xc4] ss:$16 sps:$4 sm:$0xff] (!%p240_p2)   ;;  %v4895_v18 = vld [vmem:[%s6953_s1 + $0xc0] ss:$16 sps:$4 sm:$0xff] (!%p240_p2)   ;;  %v4940_v63 = vld [vmem:[%s6953_s1 + $0x4c] ss:$16 sps:$4 sm:$0xff] (!%p240_p2)  }
   0xc   : > { %1514 = vmatprep.subr.bf16.mxu0 (!%p240_p2), %v4881_v4  ;;  %4323 = vmatprep.subr.bf16.mxu1 (!%p240_p2), %v4881_v4  ;;  %v4896_v20 = vld [vmem:[%s6953_s1 + $0xe4] ss:$16 sps:$4 sm:$0xff] (!%p240_p2)   ;;  %v4898_v21 = vld [vmem:[%s6953_s1 + $0xe0] ss:$16 sps:$4 sm:$0xff] (!%p240_p2)   ;;  %vm1448_vm1 = vcmask (!%p240_p2), 719872   ;;  %vm3842_vm2 = vcmask (!%p240_p2), 818176  }
   0xd   : > { %s6961_s11 = smov (!%p273_p3, %s3936_s11), 63  ;;  %v4899_v22 = vld [vmem:[%s6953_s1 + $0x104] ss:$16 sps:$4 sm:$0xff]   ;;  %v4901_v23 = vld [vmem:[%s6953_s1 + $0x100] ss:$16 sps:$4 sm:$0xff]  }
   0xe   : > { %s4865_s22 = smul.u32 40, %s6961_s11  ;;  %v4902_v24 = vld [vmem:[%s6953_s1 + $0x124] ss:$16 sps:$4 sm:$0xff]   ;;  %v4904_v25 = vld [vmem:[%s6953_s1 + $0x120] ss:$16 sps:$4 sm:$0xff]   ;;  %s3939_s27 = sshll.u32 %s6961_s11, 3 }
   0xf   : > { %1515 = vmatpush1.bf16.msra.mxu0 %v4883_v5  ;;  %4339 = vmatpush1.bf16.msra.mxu1 %v4883_v5  ;;  %v4905_v26 = vld [vmem:[%s6953_s1 + $0x144] ss:$16 sps:$4 sm:$0xff]   ;;  %v4907_v27 = vld [vmem:[%s6953_s1 + $0x140] ss:$16 sps:$4 sm:$0xff]   ;;  %s6851_s10 = scalar_lea.vmem %s6959_s7, %s3939_s27 }
  0x10   : > { %1516 = vmatprep.subr.bf16.mxu0 %v4884_v6  ;;  %4324 = vmatprep.subr.bf16.mxu1 %v4884_v6  ;;  %s5309_s30 = scalar_lea.vmem %s6952_s0, %s4865_s22  ;;  %v4908_v28 = vld [vmem:[%s6953_s1 + $0x164] ss:$16 sps:$4 sm:$0xff]   ;;  %v4910_v29 = vld [vmem:[%s6953_s1 + $0x160] ss:$16 sps:$4 sm:$0xff]  }
  0x11   : > { %v287_v13 = vld [vmem:[%s5309_s30 + $0x8] sm:$0xff]  ;;  %v292_v14 = vld [vmem:[%s5309_s30 + $0x30] sm:$0xff]  ;;  %v286_v38 = vld [vmem:[%s5309_s30] sm:$0xff] }
  0x12   : > { %v5319_v15 = vpack.c.bf16 %v292_v14, %v287_v13  ;;  %v367_v16 = vld [vmem:[%s5309_s30 + $0x288] sm:$0xff]  ;;  %v372_v17 = vld [vmem:[%s5309_s30 + $0x2b0] sm:$0xff]  ;;  %v366_v40 = vld [vmem:[%s5309_s30 + $0x280] sm:$0xff] }
  0x13   : > { %1517 = vmatpush1.bf16.msra.mxu0 %v4886_v7  ;;  %4340 = vmatpush1.bf16.msra.mxu1 %v4886_v7  ;;  %v5326_v19 = vpack.c.bf16 %v372_v17, %v367_v16  ;;  %v4911_v30 = vld [vmem:[%s6953_s1 + $0x184] ss:$16 sps:$4 sm:$0xff]   ;;  %v4913_v31 = vld [vmem:[%s6953_s1 + $0x180] ss:$16 sps:$4 sm:$0xff]   ;;  %v291_v39 = vld [vmem:[%s5309_s30 + $0x28] sm:$0xff] }
  0x14   : > { %1518 = vmatprep.subr.bf16.mxu0 %v4887_v8  ;;  %4325 = vmatprep.subr.bf16.mxu1 %v4887_v8  ;;  %v4914_v32 = vld [vmem:[%s6953_s1 + $0x1a4] ss:$16 sps:$4 sm:$0xff]   ;;  %v4916_v33 = vld [vmem:[%s6953_s1 + $0x1a0] ss:$16 sps:$4 sm:$0xff]   ;;  %v371_v41 = vld [vmem:[%s5309_s30 + $0x2a8] sm:$0xff]  ;;  %v5395_v45 = vpack.c.bf16 %v291_v39, %v286_v38 }
  0x15   : > { %1542 = vmatprep.mubr.bf16.mxu0 %v5319_v15  ;;  %1622 = vmatprep.mubr.bf16.mxu1 %v5326_v19  ;;  %v4917_v34 = vld [vmem:[%s6953_s1 + $0x1c4] ss:$16 sps:$4 sm:$0xff]   ;;  %v4919_v35 = vld [vmem:[%s6953_s1 + $0x1c0] ss:$16 sps:$4 sm:$0xff]   ;;  %v297_v44 = vld [vmem:[%s5309_s30 + $0x58] sm:$0xff]  ;;  %v5397_v46 = vpack.c.bf16 %v371_v41, %v366_v40 }
  0x16   : > { %v4920_v36 = vld [vmem:[%s6953_s1 + $0x1e4] ss:$16 sps:$4 sm:$0xff]   ;;  %v4922_v37 = vld [vmem:[%s6953_s1 + $0x1e0] ss:$16 sps:$4 sm:$0xff]   ;;  %v377_v48 = vld [vmem:[%s5309_s30 + $0x2d8] sm:$0xff] }
  0x17   : > { %1519 = vmatpush1.bf16.msra.mxu0 %v4889_v9  ;;  %4341 = vmatpush1.bf16.msra.mxu1 %v4889_v9  ;;  %v4925_v42 = vld [vmem:[%s6953_s1 + $0x204] ss:$16 sps:$4 sm:$0xff]   ;;  %v4923_v50 = vld [vmem:[%s6953_s1 + $0x200] ss:$16 sps:$4 sm:$0xff]   ;;  %v301_v59 = vld [vmem:[%s5309_s30 + $0x78] sm:$0xff] }
  0x18   : > { %1520 = vmatprep.subr.bf16.mxu0 %v4890_v10  ;;  %4326 = vmatprep.subr.bf16.mxu1 %v4890_v10  ;;  %v302_v47 = vld [vmem:[%s5309_s30 + $0x80] sm:$0xff]  ;;  %v296_v58 = vld [vmem:[%s5309_s30 + $0x50] sm:$0xff]  ;;  %v381_v61 = vld [vmem:[%s5309_s30 + $0x2f8] sm:$0xff] }
  0x19   : > { %v382_v49 = vld [vmem:[%s5309_s30 + $0x300] sm:$0xff]  ;;  %v5420_v56 = vpack.c.bf16 %v302_v47, %v297_v44  ;;  %v376_v60 = vld [vmem:[%s5309_s30 + $0x2d0] sm:$0xff]  ;;  %v307_v0 = vld [vmem:[%s5309_s30 + $0xa8] sm:$0xff]  ;;  %v5439_v1 = vpack.c.bf16 %v301_v59, %v296_v58 }
  0x1a   : > { %v4931_v52 = vld [vmem:[%s6953_s1 + $0x224] ss:$16 sps:$4 sm:$0xff]   ;;  %v4929_v54 = vld [vmem:[%s6953_s1 + $0x220] ss:$16 sps:$4 sm:$0xff]   ;;  %v5422_v57 = vpack.c.bf16 %v382_v49, %v377_v48  ;;  %v5441_v2 = vpack.c.bf16 %v381_v61, %v376_v60  ;;  %v387_v4 = vld [vmem:[%s5309_s30 + $0x328] sm:$0xff] }
  0x1b   : > { %1521 = vmatpush1.bf16.msra.mxu0 %v4892_v11  ;;  %4342 = vmatpush1.bf16.msra.mxu1 %v4892_v11  ;;  %v4937_v62 = vld [vmem:[%s6953_s1 + $0x244] ss:$16 sps:$4 sm:$0xff]   ;;  %v4935_v6 = vld [vmem:[%s6953_s1 + $0x240] ss:$16 sps:$4 sm:$0xff]   ;;  %v4938_v7 = vld [vmem:[%s6953_s1 + $0x48] ss:$16 sps:$4 sm:$0xff]  }
  0x1c   : > { %1522 = vmatprep.subr.bf16.mxu0 %v4893_v12  ;;  %4327 = vmatprep.subr.bf16.mxu1 %v4893_v12  ;;  %v312_v3 = vld [vmem:[%s5309_s30 + $0xd0] sm:$0xff]  ;;  %v4946_v9 = vld [vmem:[%s6953_s1 + $0x6c] ss:$16 sps:$4 sm:$0xff]   ;;  %v4944_v11 = vld [vmem:[%s6953_s1 + $0x68] ss:$16 sps:$4 sm:$0xff]  }
  0x1d   : > { %v392_v5 = vld [vmem:[%s5309_s30 + $0x350] sm:$0xff]  ;;  %v5464_v12 = vpack.c.bf16 %v312_v3, %v307_v0  ;;  %v306_v14 = vld [vmem:[%s5309_s30 + $0xa0] sm:$0xff]  ;;  %v311_v16 = vld [vmem:[%s5309_s30 + $0xc8] sm:$0xff] }
  0x1e   : > { %v4943_v8 = vld [vmem:[%s6953_s1 + $0x264] ss:$16 sps:$4 sm:$0xff]   ;;  %v4941_v10 = vld [vmem:[%s6953_s1 + $0x260] ss:$16 sps:$4 sm:$0xff]   ;;  %v5466_v13 = vpack.c.bf16 %v392_v5, %v387_v4  ;;  %v401_v39 = vld [vmem:[%s5309_s30 + $0x398] sm:$0xff] }
  0x1f   : > { %1523 = vmatpush1.bf16.msra.mxu0 %v4895_v18  ;;  %4343 = vmatpush1.bf16.msra.mxu1 %v4895_v18  ;;  %v386_v17 = vld [vmem:[%s5309_s30 + $0x320] sm:$0xff]  ;;  %v391_v18 = vld [vmem:[%s5309_s30 + $0x348] sm:$0xff]  ;;  %v396_v38 = vld [vmem:[%s5309_s30 + $0x370] sm:$0xff] }
  0x20   : > { %1524 = vmatprep.subr.bf16.mxu0 %v4896_v20  ;;  %4328 = vmatprep.subr.bf16.mxu1 %v4896_v20  ;;  %v4949_v20 = vld [vmem:[%s6953_s1 + $0x284] ss:$16 sps:$4 sm:$0xff]   ;;  %v4964_v41 = vld [vmem:[%s6953_s1 + $0xcc] ss:$16 sps:$4 sm:$0xff]   ;;  %v5533_v48 = vpack.c.bf16 %v401_v39, %v396_v38  ;;  %v4986_v39 = vld [vmem:[%s6953_s1 + $0x148] ss:$16 sps:$4 sm:$0xff]  }
  0x21   : > { %v4961_v40 = vld [vmem:[%s6953_s1 + $0x2c4] ss:$16 sps:$4 sm:$0xff]   ;;  %v407_v49 = vld [vmem:[%s5309_s30 + $0x3c8] sm:$0xff]  ;;  %v337_v4 = vld [vmem:[%s5309_s30 + $0x198] sm:$0xff] }
  0x22   : > { %v332_v44 = vld [vmem:[%s5309_s30 + $0x170] sm:$0xff]  ;;  %v326_v60 = vld [vmem:[%s5309_s30 + $0x140] sm:$0xff]  ;;  %v331_v61 = vld [vmem:[%s5309_s30 + $0x168] sm:$0xff] }
  0x23   : > { %1525 = vmatpush1.bf16.msra.mxu0 %v4898_v21  ;;  %4344 = vmatpush1.bf16.msra.mxu1 %v4898_v21  ;;  %v4952_v21 = vld [vmem:[%s6953_s1 + $0x8c] ss:$16 sps:$4 sm:$0xff]   ;;  %v4973_v0 = vld [vmem:[%s6953_s1 + $0x304] ss:$16 sps:$4 sm:$0xff]  }
  0x24   : > { %1526 = vmatprep.subr.bf16.mxu0 %v4899_v22  ;;  %4329 = vmatprep.subr.bf16.mxu1 %v4899_v22  ;;  %v317_v22 = vld [vmem:[%s5309_s30 + $0xf8] sm:$0xff]  ;;  %v342_v5 = vld [vmem:[%s5309_s30 + $0x1c0] sm:$0xff]  ;;  %v432_v38 = vld [vmem:[%s5309_s30 + $0x490] sm:$0xff] }
  0x25   : > { %v4976_v3 = vld [vmem:[%s6953_s1 + $0x10c] ss:$16 sps:$4 sm:$0xff]  }
  0x27   : > { %1527 = vmatpush1.bf16.msra.mxu0 %v4901_v23  ;;  %4345 = vmatpush1.bf16.msra.mxu1 %v4901_v23  ;;  %v5483_v23 = vpack.c.bf16 %v311_v16, %v306_v14  ;;  %v4979_v14 = vld [vmem:[%s6953_s1 + $0x324] ss:$16 sps:$4 sm:$0xff]   ;;  %v4982_v16 = vld [vmem:[%s6953_s1 + $0x12c] ss:$16 sps:$4 sm:$0xff]  }
  0x28   : > { %1528 = vmatprep.subr.bf16.mxu0 %v4902_v24  ;;  %4330 = vmatprep.subr.bf16.mxu1 %v4902_v24  ;;  %v5485_v24 = vpack.c.bf16 %v391_v18, %v386_v17  ;;  %v4977_v17 = vld [vmem:[%s6953_s1 + $0x320] ss:$16 sps:$4 sm:$0xff]   ;;  %v5593_v18 = vpack.c.bf16 %v342_v5, %v337_v4  ;;  %v4998_v5 = vld [vmem:[%s6953_s1 + $0x188] ss:$16 sps:$4 sm:$0xff]  }
  0x29   : > { %v4995_v4 = vld [vmem:[%s6953_s1 + $0x380] ss:$16 sps:$4 sm:$0xff]  }
  0x2b   : > { %1529 = vmatpush1.bf16.msra.mxu0 %v4904_v25  ;;  %4346 = vmatpush1.bf16.msra.mxu1 %v4904_v25  ;;  %v322_v25 = vld [vmem:[%s5309_s30 + $0x120] sm:$0xff] }
  0x2c   : > { %1530 = vmatprep.subr.bf16.mxu0 %v4905_v26  ;;  %4331 = vmatprep.subr.bf16.mxu1 %v4905_v26  ;;  %v397_v26 = vld [vmem:[%s5309_s30 + $0x378] sm:$0xff] }
  0x2f   : > { %1531 = vmatpush1.bf16.msra.mxu0 %v4907_v27  ;;  %4347 = vmatpush1.bf16.msra.mxu1 %v4907_v27  ;;  %v402_v27 = vld [vmem:[%s5309_s30 + $0x3a0] sm:$0xff] }
  0x30   : > { %1532 = vmatprep.subr.bf16.mxu0 %v4908_v28  ;;  %4332 = vmatprep.subr.bf16.mxu1 %v4908_v28  ;;  %v4947_v28 = vld [vmem:[%s6953_s1 + $0x280] ss:$16 sps:$4 sm:$0xff]  }
  0x33   : > { %1533 = vmatpush1.bf16.msra.mxu0 %v4910_v29  ;;  %4348 = vmatpush1.bf16.msra.mxu1 %v4910_v29  ;;  %v4950_v29 = vld [vmem:[%s6953_s1 + $0x88] ss:$16 sps:$4 sm:$0xff]  }
  0x34   : > { %1534 = vmatprep.subr.bf16.mxu0 %v4911_v30  ;;  %4333 = vmatprep.subr.bf16.mxu1 %v4911_v30  ;;  %v4955_v30 = vld [vmem:[%s6953_s1 + $0x2a4] ss:$16 sps:$4 sm:$0xff]  }
  0x37   : > { %1535 = vmatpush1.bf16.msra.mxu0 %v4913_v31  ;;  %4349 = vmatpush1.bf16.msra.mxu1 %v4913_v31  ;;  %v4958_v31 = vld [vmem:[%s6953_s1 + $0xac] ss:$16 sps:$4 sm:$0xff]  }
  0x38   : > { %1536 = vmatprep.subr.bf16.mxu0 %v4914_v32  ;;  %4334 = vmatprep.subr.bf16.mxu1 %v4914_v32  ;;  %v4953_v32 = vld [vmem:[%s6953_s1 + $0x2a0] ss:$16 sps:$4 sm:$0xff]  }
  0x3b   : > { %1537 = vmatpush1.bf16.msra.mxu0 %v4916_v33  ;;  %4350 = vmatpush1.bf16.msra.mxu1 %v4916_v33  ;;  %v4956_v33 = vld [vmem:[%s6953_s1 + $0xa8] ss:$16 sps:$4 sm:$0xff]  }
  0x3c   : > { %1538 = vmatprep.subr.bf16.mxu0 %v4917_v34  ;;  %4335 = vmatprep.subr.bf16.mxu1 %v4917_v34  ;;  %v5508_v34 = vpack.c.bf16 %v322_v25, %v317_v22  ;;  %v336_v22 = vld [vmem:[%s5309_s30 + $0x190] sm:$0xff]  ;;  %v341_v25 = vld [vmem:[%s5309_s30 + $0x1b8] sm:$0xff] }
  0x3f   : > { %1539 = vmatpush1.bf16.msra.mxu0 %v4919_v35  ;;  %4351 = vmatpush1.bf16.msra.mxu1 %v4919_v35  ;;  %v5510_v35 = vpack.c.bf16 %v402_v27, %v397_v26  ;;  %v416_v26 = vld [vmem:[%s5309_s30 + $0x410] sm:$0xff]  ;;  %v421_v27 = vld [vmem:[%s5309_s30 + $0x438] sm:$0xff] }
  0x40   : > { %1540 = vmatprep.subr.bf16.mxu0 %v4920_v36  ;;  %4336 = vmatprep.subr.bf16.mxu1 %v4920_v36  ;;  %v316_v36 = vld [vmem:[%s5309_s30 + $0xf0] sm:$0xff] }
  0x43   : > { %1541 = vmatpush1.bf16.msra.mxu0 %v4922_v37  ;;  %4352 = vmatpush1.bf16.msra.mxu1 %v4922_v37  ;;  %v321_v37 = vld [vmem:[%s5309_s30 + $0x118] sm:$0xff] }
  0x44   : > { %1703 = vmatprep.subr.bf16.mxu0 %v4925_v42  ;;  %2089 = vmatprep.subr.bf16.mxu1 %v4928_v43  ;;  %v4959_v42 = vld [vmem:[%s6953_s1 + $0x2c0] ss:$16 sps:$4 sm:$0xff]   ;;  %v327_v43 = vld [vmem:[%s5309_s30 + $0x148] sm:$0xff]  ;;  %v5531_v47 = vpack.c.bf16 %v321_v37, %v316_v36  ;;  %v5621_v36 = vpack.c.bf16 %v421_v27, %v416_v26  ;;  %v5009_v26 = vld [vmem:[%s6953_s1 + $0x3c4] ss:$16 sps:$4 sm:$0xff]  }
  0x45   : > { %v5552_v58 = vpack.c.bf16 %v332_v44, %v327_v43  ;;  %v427_v37 = vld [vmem:[%s5309_s30 + $0x468] sm:$0xff] }
  0x46   : > { %1543 = vmatmul.mubr.bf16.vlgmr.msra.gmra.mrb[0].mxu0 %v5395_v45  ;;  %1623 = vmatmul.mubr.bf16.vlgmr.msra.gmra.mrb[0].mxu1 %v5397_v46  ;;  %v4992_v43 = vld [vmem:[%s6953_s1 + $0x168] ss:$16 sps:$4 sm:$0xff]   ;;  %v5012_v27 = vld [vmem:[%s6953_s1 + $0x1cc] ss:$16 sps:$4 sm:$0xff]  }
  0x47   : > { %1704 = vmatpush1.bf16.msra.mxu0 %v4923_v50  ;;  %2090 = vmatpush1.bf16.msra.mxu1 %v4926_v51  ;;  %v412_v50 = vld [vmem:[%s5309_s30 + $0x3f0] sm:$0xff]  ;;  %v4962_v51 = vld [vmem:[%s6953_s1 + $0xc8] ss:$16 sps:$4 sm:$0xff]  }
  0x48   : > { %1705 = vmatprep.subr.bf16.mxu0 %v4931_v52  ;;  %2091 = vmatprep.subr.bf16.mxu1 %v4934_v53  ;;  %v4967_v52 = vld [vmem:[%s6953_s1 + $0x2e4] ss:$16 sps:$4 sm:$0xff]   ;;  %v4970_v53 = vld [vmem:[%s6953_s1 + $0xec] ss:$16 sps:$4 sm:$0xff]   ;;  %v5554_v59 = vpack.c.bf16 %v412_v50, %v407_v49  ;;  %v5642_v49 = vpack.c.bf16 %v432_v38, %v427_v37  ;;  %v5010_v37 = vld [vmem:[%s6953_s1 + $0x1c8] ss:$16 sps:$4 sm:$0xff]  }
  0x49   : > { %1552 = vmatprep.mubr.bf16.mxu0 %v5420_v56  ;;  %1632 = vmatprep.mubr.bf16.mxu1 %v5422_v57  ;;  %v346_v50 = vld [vmem:[%s5309_s30 + $0x1e0] sm:$0xff] }
  0x4a   : > { %v5015_v38 = vld [vmem:[%s6953_s1 + $0x3e4] ss:$16 sps:$4 sm:$0xff]  }
  0x4b   : > { %1706 = vmatpush1.bf16.msra.mxu0 %v4929_v54  ;;  %2092 = vmatpush1.bf16.msra.mxu1 %v4932_v55  ;;  %v4965_v54 = vld [vmem:[%s6953_s1 + $0x2e0] ss:$16 sps:$4 sm:$0xff]   ;;  %v4968_v55 = vld [vmem:[%s6953_s1 + $0xe8] ss:$16 sps:$4 sm:$0xff]  }
  0x4c   : > { %1707 = vmatprep.subr.bf16.mxu0 %v4937_v62  ;;  %2093 = vmatprep.subr.bf16.mxu1 %v4940_v63  ;;  %v406_v62 = vld [vmem:[%s5309_s30 + $0x3c0] sm:$0xff]  ;;  %v411_v63 = vld [vmem:[%s5309_s30 + $0x3e8] sm:$0xff] }
  0x4e   : > { %1553 = vmatmul.mubr.bf16.gmra.mrb[4].mxu0 %v5439_v1  ;;  %1633 = vmatmul.mubr.bf16.gmra.mrb[4].mxu1 %v5441_v2 }
  0x4f   : > { %1708 = vmatpush1.bf16.msra.mxu0 %v4935_v6  ;;  %2094 = vmatpush1.bf16.msra.mxu1 %v4938_v7  ;;  %v5572_v6 = vpack.c.bf16 %v331_v61, %v326_v60  ;;  %v5574_v7 = vpack.c.bf16 %v411_v63, %v406_v62  ;;  %v357_v60 = vld [vmem:[%s5309_s30 + $0x238] sm:$0xff]  ;;  %v362_v63 = vld [vmem:[%s5309_s30 + $0x260] sm:$0xff] }
  0x50   : > { %1709 = vmatprep.subr.bf16.mxu0 %v4943_v8  ;;  %2095 = vmatprep.subr.bf16.mxu1 %v4946_v9  ;;  %v417_v8 = vld [vmem:[%s5309_s30 + $0x418] sm:$0xff]  ;;  %v422_v9 = vld [vmem:[%s5309_s30 + $0x440] sm:$0xff] }
  0x51   : > { %1562 = vmatprep.mubr.bf16.mxu0 %v5464_v12  ;;  %1642 = vmatprep.mubr.bf16.mxu1 %v5466_v13 }
  0x53   : > { %1710 = vmatpush1.bf16.msra.mxu0 %v4941_v10  ;;  %2096 = vmatpush1.bf16.msra.mxu1 %v4944_v11  ;;  %v4971_v10 = vld [vmem:[%s6953_s1 + $0x300] ss:$16 sps:$4 sm:$0xff]   ;;  %v4974_v11 = vld [vmem:[%s6953_s1 + $0x108] ss:$16 sps:$4 sm:$0xff]  }
  0x54   : > { %1711 = vmatprep.subr.bf16.mxu0 %v4949_v20  ;;  %2097 = vmatprep.subr.bf16.mxu1 %v4952_v21  ;;  %v5595_v20 = vpack.c.bf16 %v422_v9, %v417_v8  ;;  %v4980_v21 = vld [vmem:[%s6953_s1 + $0x128] ss:$16 sps:$4 sm:$0xff]   ;;  %v5003_v8 = vld [vmem:[%s6953_s1 + $0x3a4] ss:$16 sps:$4 sm:$0xff]   ;;  %v5006_v9 = vld [vmem:[%s6953_s1 + $0x1ac] ss:$16 sps:$4 sm:$0xff]  }
  0x56   : > { %1563 = vmatmul.mubr.bf16.gmra.mrb[8].mxu0 %v5483_v23  ;;  %1643 = vmatmul.mubr.bf16.gmra.mrb[8].mxu1 %v5485_v24 }
  0x57   : > { %1712 = vmatpush1.bf16.msra.mxu0 %v4947_v28  ;;  %2098 = vmatpush1.bf16.msra.mxu1 %v4950_v29  ;;  %v4985_v28 = vld [vmem:[%s6953_s1 + $0x344] ss:$16 sps:$4 sm:$0xff]   ;;  %v4988_v29 = vld [vmem:[%s6953_s1 + $0x14c] ss:$16 sps:$4 sm:$0xff]  }
  0x58   : > { %1713 = vmatprep.subr.bf16.mxu0 %v4955_v30  ;;  %2099 = vmatprep.subr.bf16.mxu1 %v4958_v31  ;;  %v4983_v30 = vld [vmem:[%s6953_s1 + $0x340] ss:$16 sps:$4 sm:$0xff]   ;;  %v347_v31 = vld [vmem:[%s5309_s30 + $0x1e8] sm:$0xff] }
  0x59   : > { %1572 = vmatprep.mubr.bf16.mxu0 %v5508_v34  ;;  %1652 = vmatprep.mubr.bf16.mxu1 %v5510_v35 }
  0x5b   : > { %1714 = vmatpush1.bf16.msra.mxu0 %v4953_v32  ;;  %2100 = vmatpush1.bf16.msra.mxu1 %v4956_v33  ;;  %v352_v32 = vld [vmem:[%s5309_s30 + $0x210] sm:$0xff]  ;;  %v5619_v33 = vpack.c.bf16 %v341_v25, %v336_v22  ;;  %v441_v25 = vld [vmem:[%s5309_s30 + $0x4d8] sm:$0xff] }
  0x5c   : > { %1715 = vmatprep.subr.bf16.mxu0 %v4961_v40  ;;  %2101 = vmatprep.subr.bf16.mxu1 %v4964_v41  ;;  %v4991_v40 = vld [vmem:[%s6953_s1 + $0x364] ss:$16 sps:$4 sm:$0xff]   ;;  %v4994_v41 = vld [vmem:[%s6953_s1 + $0x16c] ss:$16 sps:$4 sm:$0xff]   ;;  %v5640_v44 = vpack.c.bf16 %v352_v32, %v347_v31 }
  0x5d   : > { %v436_v22 = vld [vmem:[%s5309_s30 + $0x4b0] sm:$0xff]  ;;  %v289_v31 = vld [vmem:[%s5309_s30 + $0x18] sm:$0xff]  ;;  %v294_v32 = vld [vmem:[%s5309_s30 + $0x40] sm:$0xff] }
  0x5e   : > { %1573 = vmatmul.mubr.bf16.gmra.mrb[12].mxu0 %v5531_v47  ;;  %1653 = vmatmul.mubr.bf16.gmra.mrb[12].mxu1 %v5533_v48 }
  0x5f   : > { %1716 = vmatpush1.bf16.msra.mxu0 %v4959_v42  ;;  %2102 = vmatpush1.bf16.msra.mxu1 %v4962_v51  ;;  %v4989_v42 = vld [vmem:[%s6953_s1 + $0x360] ss:$16 sps:$4 sm:$0xff]   ;;  %v351_v51 = vld [vmem:[%s5309_s30 + $0x208] sm:$0xff] }
  0x60   : > { %1717 = vmatprep.subr.bf16.mxu0 %v4967_v52  ;;  %2103 = vmatprep.subr.bf16.mxu1 %v4970_v53  ;;  %v426_v52 = vld [vmem:[%s5309_s30 + $0x460] sm:$0xff]  ;;  %v431_v53 = vld [vmem:[%s5309_s30 + $0x488] sm:$0xff]  ;;  %v5659_v61 = vpack.c.bf16 %v351_v51, %v346_v50  ;;  %v293_v50 = vld [vmem:[%s5309_s30 + $0x38] sm:$0xff] }
  0x61   : > { %1582 = vmatprep.mubr.bf16.mxu0 %v5552_v58  ;;  %1662 = vmatprep.mubr.bf16.mxu1 %v5554_v59  ;;  %v5661_v62 = vpack.c.bf16 %v431_v53, %v426_v52  ;;  %v5021_v51 = vld [vmem:[%s6953_s1 + $0x404] ss:$16 sps:$4 sm:$0xff]   ;;  %v5024_v52 = vld [vmem:[%s6953_s1 + $0x20c] ss:$16 sps:$4 sm:$0xff]  }
  0x62   : > { %v299_v53 = vld [vmem:[%s5309_s30 + $0x68] sm:$0xff] }
  0x63   : > { %1718 = vmatpush1.bf16.msra.mxu0 %v4965_v54  ;;  %2104 = vmatpush1.bf16.msra.mxu1 %v4968_v55  ;;  %v4997_v54 = vld [vmem:[%s6953_s1 + $0x384] ss:$16 sps:$4 sm:$0xff]   ;;  %v5000_v55 = vld [vmem:[%s6953_s1 + $0x18c] ss:$16 sps:$4 sm:$0xff]  }
  0x64   : > { %1719 = vmatprep.subr.bf16.mxu0 %v4973_v0  ;;  %2105 = vmatprep.subr.bf16.mxu1 %v4976_v3  ;;  %v437_v0 = vld [vmem:[%s5309_s30 + $0x4b8] sm:$0xff]  ;;  %v442_v3 = vld [vmem:[%s5309_s30 + $0x4e0] sm:$0xff] }
  0x66   : > { %1583 = vmatmul.mubr.bf16.gmra.mrb[16].mxu0 %v5572_v6  ;;  %1663 = vmatmul.mubr.bf16.gmra.mrb[16].mxu1 %v5574_v7 }
  0x67   : > { %1720 = vmatpush1.bf16.msra.mxu0 %v4971_v10  ;;  %2106 = vmatpush1.bf16.msra.mxu1 %v4974_v11  ;;  %v5001_v10 = vld [vmem:[%s6953_s1 + $0x3a0] ss:$16 sps:$4 sm:$0xff]   ;;  %v5681_v11 = vpack.c.bf16 %v362_v63, %v357_v60  ;;  %v5022_v63 = vld [vmem:[%s6953_s1 + $0x208] ss:$16 sps:$4 sm:$0xff]  }
  0x68   : > { %1721 = vmatprep.subr.bf16.mxu0 %v4979_v14  ;;  %2107 = vmatprep.subr.bf16.mxu1 %v4982_v16  ;;  %v5683_v14 = vpack.c.bf16 %v442_v3, %v437_v0  ;;  %v5004_v16 = vld [vmem:[%s6953_s1 + $0x1a8] ss:$16 sps:$4 sm:$0xff]   ;;  %v5019_v60 = vld [vmem:[%s6953_s1 + $0x400] ss:$16 sps:$4 sm:$0xff]   ;;  %v5027_v3 = vld [vmem:[%s6953_s1 + $0x22c] ss:$16 sps:$4 sm:$0xff]  }
  0x69   : > { %1592 = vmatprep.mubr.bf16.mxu0 %v5593_v18  ;;  %1672 = vmatprep.mubr.bf16.mxu1 %v5595_v20 }
  0x6b   : > { %1722 = vmatpush1.bf16.msra.mxu0 %v4977_v17  ;;  %2108 = vmatpush1.bf16.msra.mxu1 %v4980_v21  ;;  %v356_v17 = vld [vmem:[%s5309_s30 + $0x230] sm:$0xff]  ;;  %v361_v21 = vld [vmem:[%s5309_s30 + $0x258] sm:$0xff] }
  0x6c   : > { %1723 = vmatprep.subr.bf16.mxu0 %v4985_v28  ;;  %2109 = vmatprep.subr.bf16.mxu1 %v4988_v29  ;;  %v5007_v28 = vld [vmem:[%s6953_s1 + $0x3c0] ss:$16 sps:$4 sm:$0xff]   ;;  %v5705_v29 = vpack.c.bf16 %v361_v21, %v356_v17  ;;  %v5045_v17 = vld [vmem:[%s6953_s1 + $0x444] ss:$16 sps:$4 sm:$0xff]  }
  0x6e   : > { %1593 = vmatmul.mubr.bf16.gmra.mrb[20].mxu0 %v5619_v33  ;;  %1673 = vmatmul.mubr.bf16.gmra.mrb[20].mxu1 %v5621_v36 }
  0x6f   : > { %1724 = vmatpush1.bf16.msra.mxu0 %v4983_v30  ;;  %2110 = vmatpush1.bf16.msra.mxu1 %v4986_v39  ;;  %v5707_v30 = vpack.c.bf16 %v441_v25, %v436_v22  ;;  %v5018_v39 = vld [vmem:[%s6953_s1 + $0x1ec] ss:$16 sps:$4 sm:$0xff]   ;;  %v5043_v25 = vld [vmem:[%s6953_s1 + $0x440] ss:$16 sps:$4 sm:$0xff]  }
  0x70   : > { %1725 = vmatprep.subr.bf16.mxu0 %v4991_v40  ;;  %2111 = vmatprep.subr.bf16.mxu1 %v4994_v41  ;;  %v5720_v40 = vpack.c.bf16 %v294_v32, %v289_v31  ;;  %v5013_v41 = vld [vmem:[%s6953_s1 + $0x3e0] ss:$16 sps:$4 sm:$0xff]   ;;  %v5054_v31 = vld [vmem:[%s6953_s1 + $0x464] ss:$16 sps:$4 sm:$0xff]   ;;  %v319_v32 = vld [vmem:[%s5309_s30 + $0x108] sm:$0xff] }
  0x71   : > { %1602 = vmatprep.mubr.bf16.mxu0 %v5640_v44  ;;  %1682 = vmatprep.mubr.bf16.mxu1 %v5642_v49 }
  0x73   : > { %1726 = vmatpush1.bf16.msra.mxu0 %v4989_v42  ;;  %2112 = vmatpush1.bf16.msra.mxu1 %v4992_v43  ;;  %v5016_v42 = vld [vmem:[%s6953_s1 + $0x1e8] ss:$16 sps:$4 sm:$0xff]   ;;  %v288_v43 = vld [vmem:[%s5309_s30 + $0x10] sm:$0xff] }
  0x74   : > { %1727 = vmatprep.subr.bf16.mxu0 %v4997_v54  ;;  %2113 = vmatprep.subr.bf16.mxu1 %v5000_v55  ;;  %v304_v54 = vld [vmem:[%s5309_s30 + $0x90] sm:$0xff]  ;;  %v5742_v55 = vpack.c.bf16 %v293_v50, %v288_v43  ;;  %v5037_v43 = vld [vmem:[%s6953_s1 + $0x288] ss:$16 sps:$4 sm:$0xff]  }
  0x75   : > { %v5750_v0 = vpack.c.bf16 %v304_v54, %v299_v53  ;;  %v5064_v50 = vld [vmem:[%s6953_s1 + $0x480] ss:$16 sps:$4 sm:$0xff]   ;;  %v323_v54 = vld [vmem:[%s5309_s30 + $0x128] sm:$0xff] }
  0x76   : > { %1603 = vmatmul.mubr.bf16.gmra.mrb[24].mxu0 %v5659_v61  ;;  %1683 = vmatmul.mubr.bf16.gmra.mrb[24].mxu1 %v5661_v62  ;;  %v318_v53 = vld [vmem:[%s5309_s30 + $0x100] sm:$0xff] }
  0x77   : > { %1728 = vmatpush1.bf16.msra.mxu0 %v4995_v4  ;;  %2114 = vmatpush1.bf16.msra.mxu1 %v4998_v5  ;;  %v5033_v4 = vld [vmem:[%s6953_s1 + $0x424] ss:$16 sps:$4 sm:$0xff]   ;;  %v303_v5 = vld [vmem:[%s5309_s30 + $0x88] sm:$0xff] }
  0x78   : > { %1729 = vmatprep.subr.bf16.mxu0 %v5003_v8  ;;  %2115 = vmatprep.subr.bf16.mxu1 %v5006_v9  ;;  %v5025_v8 = vld [vmem:[%s6953_s1 + $0x228] ss:$16 sps:$4 sm:$0xff]  }
  0x79   : > { %1612 = vmatprep.mubr.bf16.mxu0 %v5681_v11  ;;  %1692 = vmatprep.mubr.bf16.mxu1 %v5683_v14  ;;  %v309_v9 = vld [vmem:[%s5309_s30 + $0xb8] sm:$0xff] }
  0x7b   : > { %1730 = vmatpush1.bf16.msra.mxu0 %v5001_v10  ;;  %2116 = vmatpush1.bf16.msra.mxu1 %v5004_v16  ;;  %v5031_v10 = vld [vmem:[%s6953_s1 + $0x420] ss:$16 sps:$4 sm:$0xff]  }
  0x7c   : > { %1731 = vmatprep.subr.bf16.mxu0 %v5009_v26  ;;  %2117 = vmatprep.subr.bf16.mxu1 %v5012_v27  ;;  %v314_v16 = vld [vmem:[%s5309_s30 + $0xe0] sm:$0xff]  ;;  %v308_v26 = vld [vmem:[%s5309_s30 + $0xb0] sm:$0xff]  ;;  %v313_v27 = vld [vmem:[%s5309_s30 + $0xd8] sm:$0xff] }
  0x7d   : > { %v5780_v22 = vpack.c.bf16 %v314_v16, %v309_v9  ;;  %v333_v16 = vld [vmem:[%s5309_s30 + $0x178] sm:$0xff] }
  0x7e   : > { %1613 = vmatmul.mubr.bf16.gmra.mrb[28].mxu0 %v5705_v29  ;;  %1693 = vmatmul.mubr.bf16.gmra.mrb[28].mxu1 %v5707_v30 }
  0x7f   : > { %1732 = vmatpush1.bf16.msra.mxu0 %v5007_v28  ;;  %2118 = vmatpush1.bf16.msra.mxu1 %v5010_v37  ;;  %v5036_v28 = vld [vmem:[%s6953_s1 + $0x26c] ss:$16 sps:$4 sm:$0xff]   ;;  %v324_v37 = vld [vmem:[%s5309_s30 + $0x130] sm:$0xff] }
  0x80   : > { %1733 = vmatprep.subr.bf16.mxu0 %v5015_v38  ;;  %2119 = vmatprep.subr.bf16.mxu1 %v5018_v39  ;;  %v5034_v38 = vld [vmem:[%s6953_s1 + $0x268] ss:$16 sps:$4 sm:$0xff]   ;;  %v5039_v39 = vld [vmem:[%s6953_s1 + $0x28c] ss:$16 sps:$4 sm:$0xff]  }
  0x81   : > { %1735 = vmatprep.mubr.bf16.mxu0 %v5720_v40  ;;  %2121 = vmatprep.mubr.bf16.mxu1 %v5319_v15  ;;  %v298_v15 = vld [vmem:[%s5309_s30 + $0x60] sm:$0xff] }
  0x82   : > { %v5778_v21 = vpack.c.bf16 %v303_v5, %v298_v15  ;;  %v329_v15 = vld [vmem:[%s5309_s30 + $0x158] sm:$0xff] }
  0x83   : > { %1734 = vmatpush1.bf16.msra.mxu0 %v5013_v41  ;;  %2120 = vmatpush1.bf16.msra.mxu1 %v5016_v42  ;;  %v5066_v41 = vld [vmem:[%s6953_s1 + $0x484] ss:$16 sps:$4 sm:$0xff]   ;;  %v5817_v42 = vpack.c.bf16 %v313_v27, %v308_v26  ;;  %v5048_v5 = vld [vmem:[%s6953_s1 + $0x2cc] ss:$16 sps:$4 sm:$0xff]  }
  0x84   : > { %1896 = vmatprep.subr.bf16.mxu0 %v5021_v51  ;;  %2282 = vmatprep.subr.bf16.mxu1 %v5024_v52  ;;  %v5825_v51 = vpack.c.bf16 %v324_v37, %v319_v32  ;;  %v5042_v52 = vld [vmem:[%s6953_s1 + $0x2ac] ss:$16 sps:$4 sm:$0xff]  }
  0x85   : > { %v5057_v26 = vld [vmem:[%s6953_s1 + $0x30c] ss:$16 sps:$4 sm:$0xff]  }
  0x86   : > { %1736 = vmatmul.mubr.bf16.vlgmr.msra.gmra.mrb[0].mxu0 %v5742_v55  ;;  %2122 = vmatmul.mubr.bf16.vlgmr.msra.gmra.mrb[32].mxu1 %v5395_v45  ;;  %v5030_v45 = vld [vmem:[%s6953_s1 + $0x24c] ss:$16 sps:$4 sm:$0xff]  }
  0x87   : > { %1897 = vmatpush1.bf16.msra.mxu0 %v5019_v60  ;;  %2283 = vmatpush1.bf16.msra.mxu1 %v5022_v63  ;;  %v343_v32 = vld [vmem:[%s5309_s30 + $0x1c8] sm:$0xff]  ;;  %v349_v37 = vld [vmem:[%s5309_s30 + $0x1f8] sm:$0xff] }
  0x88   : > { %1745 = vmatprep.mubr.bf16.mxu0 %v5750_v0  ;;  %2131 = vmatprep.mubr.bf16.mxu1 %v5420_v56  ;;  %v5028_v56 = vld [vmem:[%s6953_s1 + $0x248] ss:$16 sps:$4 sm:$0xff]  }
  0x89   : > { %2284 = vmatprep.subr.bf16.mxu1 %v5027_v3  ;;  %1898 = vmatprep.subr.bf16.mxu0 %v5033_v4  ;;  %v334_v3 = vld [vmem:[%s5309_s30 + $0x180] sm:$0xff]  ;;  %v5040_v4 = vld [vmem:[%s6953_s1 + $0x2a8] ss:$16 sps:$4 sm:$0xff]  }
  0x8a   : > { %v5848_v9 = vpack.c.bf16 %v334_v3, %v329_v15  ;;  %v5070_v15 = vld [vmem:[%s6953_s1 + $0x388] ss:$16 sps:$4 sm:$0xff]   ;;  %v358_v3 = vld [vmem:[%s5309_s30 + $0x240] sm:$0xff] }
  0x8b   : > { %2285 = vmatpush1.bf16.msra.mxu1 %v5025_v8  ;;  %1899 = vmatpush1.bf16.msra.mxu0 %v5031_v10  ;;  %v5846_v8 = vpack.c.bf16 %v323_v54, %v318_v53  ;;  %v328_v10 = vld [vmem:[%s5309_s30 + $0x150] sm:$0xff]  ;;  %v5067_v54 = vld [vmem:[%s6953_s1 + $0x368] ss:$16 sps:$4 sm:$0xff]  }
  0x8c   : > { %2286 = vmatprep.subr.bf16.mxu1 %v5030_v45  ;;  %1900 = vmatprep.subr.bf16.mxu0 %v5045_v17  ;;  %v5051_v45 = vld [vmem:[%s6953_s1 + $0x2ec] ss:$16 sps:$4 sm:$0xff]   ;;  %v5870_v27 = vpack.c.bf16 %v333_v16, %v328_v10  ;;  %v364_v53 = vld [vmem:[%s5309_s30 + $0x270] sm:$0xff]  ;;  %v5078_v16 = vld [vmem:[%s6953_s1 + $0x3c8] ss:$16 sps:$4 sm:$0xff]  }
  0x8d   : > { %v339_v17 = vld [vmem:[%s5309_s30 + $0x1a8] sm:$0xff] }
  0x8e   : > { %1746 = vmatmul.mubr.bf16.gmra.mrb[4].mxu0 %v5778_v21  ;;  %2132 = vmatmul.mubr.bf16.gmra.mrb[36].mxu1 %v5439_v1  ;;  %v5052_v1 = vld [vmem:[%s6953_s1 + $0x460] ss:$16 sps:$4 sm:$0xff]  }
  0x8f   : > { %1755 = vmatprep.mubr.bf16.mxu0 %v5780_v22  ;;  %2141 = vmatprep.mubr.bf16.mxu1 %v5464_v12  ;;  %v674_v12 = vld [vmem:[%s6953_s1 + $0x4a0] sm:$0xff] }
  0x90   : > { %2287 = vmatpush1.bf16.msra.mxu1 %v5028_v56  ;;  %1901 = vmatpush1.bf16.msra.mxu0 %v5043_v25  ;;  %v4089_v60 = vcombine.high %v674_v12, %v674_v12  ;;  %v4088_v63 = vcombine.low %v674_v12, %v674_v12  ;;  %v344_v56 = vld [vmem:[%s5309_s30 + $0x1d0] sm:$0xff]  ;;  %v5049_v25 = vld [vmem:[%s6953_s1 + $0x2e8] ss:$16 sps:$4 sm:$0xff]  }
  0x91   : > { %2288 = vmatprep.subr.bf16.mxu1 %v5036_v28  ;;  %1902 = vmatprep.subr.bf16.mxu0 %v5054_v31  ;;  %v5055_v28 = vld [vmem:[%s6953_s1 + $0x308] ss:$16 sps:$4 sm:$0xff]   ;;  %v5060_v31 = vld [vmem:[%s6953_s1 + $0x32c] ss:$16 sps:$4 sm:$0xff]  }
  0x92   : > { %v5061_v12 = vld [vmem:[%s6953_s1 + $0x348] ss:$16 sps:$4 sm:$0xff]  }
  0x94   : > { %2289 = vmatpush1.bf16.msra.mxu1 %v5034_v38  ;;  %1903 = vmatpush1.bf16.msra.mxu0 %v5052_v1  ;;  %v354_v38 = vld [vmem:[%s5309_s30 + $0x220] sm:$0xff]  ;;  %v5063_v1 = vld [vmem:[%s6953_s1 + $0x34c] ss:$16 sps:$4 sm:$0xff]  }
  0x95   : > { %2290 = vmatprep.subr.bf16.mxu1 %v5039_v39  ;;  %1904 = vmatprep.subr.bf16.mxu0 %v5066_v41  ;;  %v5058_v39 = vld [vmem:[%s6953_s1 + $0x328] ss:$16 sps:$4 sm:$0xff]  }
  0x96   : > { %1756 = vmatmul.mubr.bf16.gmra.mrb[8].mxu0 %v5817_v42  ;;  %2142 = vmatmul.mubr.bf16.gmra.mrb[40].mxu1 %v5483_v23  ;;  %v1499_v23 = vsel %vm1497_vm0, %v4088_v63, 0 }
  0x97   : > { %1765 = vmatprep.mubr.bf16.mxu0 %v5825_v51  ;;  %2151 = vmatprep.mubr.bf16.mxu1 %v5508_v34  ;;  %v5046_v34 = vld [vmem:[%s6953_s1 + $0x2c8] ss:$16 sps:$4 sm:$0xff]  }
  0x98   : > { %2291 = vmatpush1.bf16.msra.mxu1 %v5037_v43  ;;  %1905 = vmatpush1.bf16.msra.mxu0 %v5064_v50  ;;  %v5069_v43 = vld [vmem:[%s6953_s1 + $0x36c] ss:$16 sps:$4 sm:$0xff]  }
  0x99   : > { %2292 = vmatprep.subr.bf16.mxu1 %v5042_v52  ;;  %4092 = vmatprep.subr.msk.bf16.mxu0 %vm1497_vm0, %v4089_v60  ;;  %v353_v50 = vld [vmem:[%s5309_s30 + $0x218] sm:$0xff]  ;;  %v359_v52 = vld [vmem:[%s5309_s30 + $0x248] sm:$0xff] }
  0x9a   : > { %v5072_v60 = vld [vmem:[%s6953_s1 + $0x38c] ss:$16 sps:$4 sm:$0xff]   ;;  %v5920_v63 = vpack.c.bf16 %v364_v53, %v359_v52  ;;  %v414_v53 = vld [vmem:[%s5309_s30 + $0x400] sm:$0xff] }
  0x9b   : > { %v409_v52 = vld [vmem:[%s5309_s30 + $0x3d8] sm:$0xff] }
  0x9c   : > { %2293 = vmatpush1.bf16.msra.mxu1 %v5040_v4  ;;  %1907 = vmatpush1.bf16.msra.mxu0 %v1499_v23  ;;  %v363_v4 = vld [vmem:[%s5309_s30 + $0x268] sm:$0xff]  ;;  %v374_v23 = vld [vmem:[%s5309_s30 + $0x2c0] sm:$0xff] }
  0x9d   : > { %2294 = vmatprep.subr.bf16.mxu1 %v5048_v5  ;;  %v369_v5 = vld [vmem:[%s5309_s30 + $0x298] sm:$0xff]  ;;  %v5942_v10 = vpack.c.bf16 %v363_v4, %v358_v3  ;;  %v424_v3 = vld [vmem:[%s5309_s30 + $0x450] sm:$0xff] }
  0x9e   : > { %1766 = vmatmul.mubr.bf16.gmra.mrb[12].mxu0 %v5846_v8  ;;  %2152 = vmatmul.mubr.bf16.gmra.mrb[44].mxu1 %v5531_v47  ;;  %v5872_v47 = vpack.c.bf16 %v344_v56, %v339_v17  ;;  %v368_v17 = vld [vmem:[%s5309_s30 + $0x290] sm:$0xff]  ;;  %v373_v56 = vld [vmem:[%s5309_s30 + $0x2b8] sm:$0xff] }
  0x9f   : > { %1775 = vmatprep.mubr.bf16.mxu0 %v5848_v9  ;;  %2161 = vmatprep.mubr.bf16.mxu1 %v5552_v58  ;;  %v338_v58 = vld [vmem:[%s5309_s30 + $0x1a0] sm:$0xff] }
  0xa0   : > { %2295 = vmatpush1.bf16.msra.mxu1 %v5046_v34  ;;  %v5894_v41 = vpack.c.bf16 %v343_v32, %v338_v58  ;;  %v5073_v34 = vld [vmem:[%s6953_s1 + $0x3a8] ss:$16 sps:$4 sm:$0xff]   ;;  %v378_v58 = vld [vmem:[%s5309_s30 + $0x2e0] sm:$0xff] }
  0xa1   : > { %2296 = vmatprep.subr.bf16.mxu1 %v5051_v45  ;;  %v5083_v45 = vld [vmem:[%s6953_s1 + $0x3ec] ss:$16 sps:$4 sm:$0xff]  }
  0xa2   : > { %v383_v32 = vld [vmem:[%s5309_s30 + $0x308] sm:$0xff] }
  0xa4   : > { %2297 = vmatpush1.bf16.msra.mxu1 %v5049_v25  ;;  %v379_v25 = vld [vmem:[%s5309_s30 + $0x2e8] sm:$0xff] }
  0xa5   : > { %2298 = vmatprep.subr.bf16.mxu1 %v5057_v26  ;;  %v384_v26 = vld [vmem:[%s5309_s30 + $0x310] sm:$0xff] }
  0xa6   : > { %1776 = vmatmul.mubr.bf16.gmra.mrb[16].mxu0 %v5870_v27  ;;  %2162 = vmatmul.mubr.bf16.gmra.mrb[48].mxu1 %v5572_v6  ;;  %v5896_v6 = vpack.c.bf16 %v354_v38, %v349_v37  ;;  %v389_v37 = vld [vmem:[%s5309_s30 + $0x338] sm:$0xff]  ;;  %v394_v38 = vld [vmem:[%s5309_s30 + $0x360] sm:$0xff] }
  0xa7   : > { %1785 = vmatprep.mubr.bf16.mxu0 %v5872_v47  ;;  %2171 = vmatprep.mubr.bf16.mxu1 %v5593_v18  ;;  %v348_v18 = vld [vmem:[%s5309_s30 + $0x1f0] sm:$0xff] }
  0xa8   : > { %2299 = vmatpush1.bf16.msra.mxu1 %v5055_v28  ;;  %v5081_v28 = vld [vmem:[%s6953_s1 + $0x3e8] ss:$16 sps:$4 sm:$0xff]  }
  0xa9   : > { %2300 = vmatprep.subr.bf16.mxu1 %v5060_v31  ;;  %v5966_v31 = vpack.c.bf16 %v373_v56, %v368_v17  ;;  %v444_v17 = vld [vmem:[%s5309_s30 + $0x4f0] sm:$0xff] }
  0xac   : > { %2301 = vmatpush1.bf16.msra.mxu1 %v5058_v39  ;;  %v5978_v39 = vpack.c.bf16 %v383_v32, %v378_v58  ;;  %v5099_v32 = vld [vmem:[%s6955_s3] ss:$8 sps:$4 sm:$0xff]  }
  0xad   : > { %2302 = vmatprep.subr.bf16.mxu1 %v5063_v1  ;;  %v5980_v1 = vpack.c.bf16 %v394_v38, %v389_v37  ;;  %v300_v37 = vld [vmem:[%s5309_s30 + $0x70] sm:$0xff]  ;;  %v305_v38 = vld [vmem:[%s5309_s30 + $0x98] sm:$0xff] }
  0xae   : > { %1786 = vmatmul.mubr.bf16.gmra.mrb[20].mxu0 %v5894_v41  ;;  %2172 = vmatmul.mubr.bf16.gmra.mrb[52].mxu1 %v5619_v33  ;;  %v5918_v33 = vpack.c.bf16 %v353_v50, %v348_v18 }
  0xaf   : > { %1795 = vmatprep.mubr.bf16.mxu0 %v5896_v6  ;;  %2181 = vmatprep.mubr.bf16.mxu1 %v5640_v44  ;;  %v5075_v44 = vld [vmem:[%s6953_s1 + $0x3ac] ss:$16 sps:$4 sm:$0xff]  }
  0xb0   : > { %2303 = vmatpush1.bf16.msra.mxu1 %v5061_v12  ;;  %v399_v12 = vld [vmem:[%s5309_s30 + $0x388] sm:$0xff] }
  0xb1   : > { %2304 = vmatprep.subr.bf16.mxu1 %v5069_v43  ;;  %v404_v43 = vld [vmem:[%s5309_s30 + $0x3b0] sm:$0xff] }
  0xb2   : > { %v5992_v50 = vpack.c.bf16 %v404_v43, %v399_v12  ;;  %v6089_v12 = vpack.c.bf16 %v305_v38, %v300_v37  ;;  %v5109_v43 = vld [vmem:[%s6955_s3 + $0x24] ss:$8 sps:$4 sm:$0xff]  }
  0xb3   : > { %v335_v37 = vld [vmem:[%s5309_s30 + $0x188] sm:$0xff] }
  0xb4   : > { %2305 = vmatpush1.bf16.msra.mxu1 %v5067_v54 }
  0xb5   : > { %2306 = vmatprep.subr.bf16.mxu1 %v5072_v60  ;;  %v6004_v60 = vpack.c.bf16 %v414_v53, %v409_v52  ;;  %v5112_v52 = vld [vmem:[%s6955_s3 + $0x34] ss:$8 sps:$4 sm:$0xff]   ;;  %v310_v53 = vld [vmem:[%s5309_s30 + $0xc0] sm:$0xff] }
  0xb6   : > { %1796 = vmatmul.mubr.bf16.gmra.mrb[24].mxu0 %v5918_v33  ;;  %2182 = vmatmul.mubr.bf16.gmra.mrb[56].mxu1 %v5659_v61  ;;  %v5080_v61 = vld [vmem:[%s6953_s1 + $0x3cc] ss:$16 sps:$4 sm:$0xff]  }
  0xb7   : > { %1805 = vmatprep.mubr.bf16.mxu0 %v5920_v63  ;;  %2191 = vmatprep.mubr.bf16.mxu1 %v5681_v11  ;;  %v5944_v11 = vpack.c.bf16 %v374_v23, %v369_v5  ;;  %v423_v5 = vld [vmem:[%s5309_s30 + $0x448] sm:$0xff]  ;;  %v429_v23 = vld [vmem:[%s5309_s30 + $0x478] sm:$0xff] }
  0xb8   : > { %2307 = vmatpush1.bf16.msra.mxu1 %v5070_v15  ;;  %v413_v15 = vld [vmem:[%s5309_s30 + $0x3f8] sm:$0xff] }
  0xb9   : > { %2308 = vmatprep.subr.bf16.mxu1 %v5075_v44  ;;  %v419_v44 = vld [vmem:[%s5309_s30 + $0x428] sm:$0xff] }
  0xbc   : > { %2309 = vmatpush1.bf16.msra.mxu1 %v5073_v34  ;;  %v434_v34 = vld [vmem:[%s5309_s30 + $0x4a0] sm:$0xff] }
  0xbd   : > { %2310 = vmatprep.subr.bf16.mxu1 %v5080_v61 }
  0xbe   : > { %1806 = vmatmul.mubr.bf16.gmra.mrb[28].mxu0 %v5942_v10  ;;  %2192 = vmatmul.mubr.bf16.gmra.mrb[60].mxu1 %v5705_v29  ;;  %v5086_v29 = vld [vmem:[%s6953_s1 + $0x40c] ss:$16 sps:$4 sm:$0xff]  }
  0xbf   : > { %1815 = vmatprep.mubr.bf16.mxu0 %v5944_v11  ;;  %2201 = vmatprep.mubr.bf16.mxu1 %v5326_v19  ;;  %v5968_v19 = vpack.c.bf16 %v384_v26, %v379_v25 }
  0xc0   : > { %2311 = vmatpush1.bf16.msra.mxu1 %v5078_v16  ;;  %v6031_v16 = vpack.c.bf16 %v434_v34, %v429_v23  ;;  %v5113_v34 = vld [vmem:[%s6955_s3 + $0x40] ss:$8 sps:$4 sm:$0xff]  }
  0xc1   : > { %2312 = vmatprep.subr.bf16.mxu1 %v5083_v45  ;;  %v439_v45 = vld [vmem:[%s5309_s30 + $0x4c8] sm:$0xff] }
  0xc2   : > { %v6043_v25 = vpack.c.bf16 %v444_v17, %v439_v45  ;;  %v325_v45 = vld [vmem:[%s5309_s30 + $0x138] sm:$0xff] }
  0xc4   : > { %2313 = vmatpush1.bf16.msra.mxu1 %v5081_v28  ;;  %v5221_v28 = vmov 0  }
  0xc5   : > { %2475 = vmatprep.subr.bf16.mxu1 %v5086_v29  ;;  %v295_v29 = vld [vmem:[%s5309_s30 + $0x48] sm:$0xff] }
  0xc6   : > { %1816 = vmatmul.mubr.bf16.gmra.mrb[32].mxu0 %v5966_v31  ;;  %2202 = vmatmul.mubr.bf16.gmra.mrb[64].mxu1 %v5397_v46  ;;  %v388_v46 = vld [vmem:[%s5309_s30 + $0x330] sm:$0xff] }
  0xc7   : > { %1825 = vmatprep.mubr.bf16.mxu0 %v5968_v19  ;;  %2211 = vmatprep.mubr.bf16.mxu1 %v5422_v57  ;;  %v393_v57 = vld [vmem:[%s5309_s30 + $0x358] sm:$0xff] }
  0xc8   : > { %v5990_v18 = vpack.c.bf16 %v393_v57, %v388_v46  ;;  %v5087_v46 = vld [vmem:[%s6953_s1 + $0x428] ss:$16 sps:$4 sm:$0xff]  }
  0xc9   : > { %v5102_v57 = vld [vmem:[%s6955_s3 + $0x10] ss:$8 sps:$4 sm:$0xff]  }
  0xce   : > { %1826 = vmatmul.mubr.bf16.gmra.mrb[36].mxu0 %v5978_v39  ;;  %2212 = vmatmul.mubr.bf16.gmra.mrb[68].mxu1 %v5441_v2  ;;  %v398_v2 = vld [vmem:[%s5309_s30 + $0x380] sm:$0xff] }
  0xcf   : > { %1835 = vmatprep.mubr.bf16.mxu0 %v5980_v1  ;;  %2221 = vmatprep.mubr.bf16.mxu1 %v5466_v13  ;;  %v403_v13 = vld [vmem:[%s5309_s30 + $0x3a8] sm:$0xff] }
  0xd0   : > { %v6002_v54 = vpack.c.bf16 %v403_v13, %v398_v2  ;;  %v5095_v2 = vld [vmem:[%s6953_s1 + $0x46c] ss:$16 sps:$4 sm:$0xff]   ;;  %v5107_v13 = vld [vmem:[%s6955_s3 + $0x20] ss:$8 sps:$4 sm:$0xff]  }
  0xd6   : > { %1836 = vmatmul.mubr.bf16.gmra.mrb[40].mxu0 %v5990_v18  ;;  %2222 = vmatmul.mubr.bf16.gmra.mrb[72].mxu1 %v5485_v24  ;;  %v5101_v24 = vld [vmem:[%s6955_s3 + $0x4] ss:$8 sps:$4 sm:$0xff]  }
  0xd7   : > { %1845 = vmatprep.mubr.bf16.mxu0 %v5992_v50  ;;  %2231 = vmatprep.mubr.bf16.mxu1 %v5510_v35  ;;  %v408_v35 = vld [vmem:[%s5309_s30 + $0x3d0] sm:$0xff] }
  0xd8   : > { %3128 = vmatprep.subr.bf16.mxu0 %v5101_v24  ;;  %v6017_v4 = vpack.c.bf16 %v413_v15, %v408_v35  ;;  %v315_v24 = vld [vmem:[%s5309_s30 + $0xe8] sm:$0xff]  ;;  %v5110_v15 = vld [vmem:[%s6955_s3 + $0x30] ss:$8 sps:$4 sm:$0xff]  }
  0xd9   : > { %v5093_v35 = vld [vmem:[%s6953_s1 + $0x468] ss:$16 sps:$4 sm:$0xff]  }
  0xde   : > { %1846 = vmatmul.mubr.bf16.gmra.mrb[44].mxu0 %v6002_v54  ;;  %2232 = vmatmul.mubr.bf16.gmra.mrb[76].mxu1 %v5533_v48  ;;  %v6019_v48 = vpack.c.bf16 %v424_v3, %v419_v44  ;;  %v6122_v44 = vpack.c.bf16 %v315_v24, %v310_v53  ;;  %v5096_v3 = vld [vmem:[%s6953_s1 + $0x488] ss:$16 sps:$4 sm:$0xff]  }
  0xdf   : > { %1855 = vmatprep.mubr.bf16.mxu0 %v6004_v60  ;;  %2241 = vmatprep.mubr.bf16.mxu1 %v5554_v59  ;;  %v418_v59 = vld [vmem:[%s5309_s30 + $0x420] sm:$0xff] }
  0xe0   : > { %v6029_v61 = vpack.c.bf16 %v423_v5, %v418_v59  ;;  %v5115_v59 = vld [vmem:[%s6955_s3 + $0x44] ss:$8 sps:$4 sm:$0xff]  }
  0xe6   : > { %1856 = vmatmul.mubr.bf16.gmra.mrb[48].mxu0 %v6017_v4  ;;  %2242 = vmatmul.mubr.bf16.gmra.mrb[80].mxu1 %v5574_v7  ;;  %v428_v7 = vld [vmem:[%s5309_s30 + $0x470] sm:$0xff] }
  0xe7   : > { %1865 = vmatprep.mubr.bf16.mxu0 %v6019_v48  ;;  %2251 = vmatprep.mubr.bf16.mxu1 %v5595_v20  ;;  %v433_v20 = vld [vmem:[%s5309_s30 + $0x498] sm:$0xff] }
  0xe8   : > { %v6041_v56 = vpack.c.bf16 %v433_v20, %v428_v7  ;;  %v5118_v7 = vld [vmem:[%s6955_s3 + $0x54] ss:$8 sps:$4 sm:$0xff]  }
  0xe9   : > { %v320_v20 = vld [vmem:[%s5309_s30 + $0x110] sm:$0xff] }
  0xee   : > { %1866 = vmatmul.mubr.bf16.gmra.mrb[52].mxu0 %v6029_v61  ;;  %2252 = vmatmul.mubr.bf16.gmra.mrb[84].mxu1 %v5621_v36  ;;  %v438_v36 = vld [vmem:[%s5309_s30 + $0x4c0] sm:$0xff] }
  0xef   : > { %1875 = vmatprep.mubr.bf16.mxu0 %v6031_v16  ;;  %2261 = vmatprep.mubr.bf16.mxu1 %v5642_v49  ;;  %v443_v49 = vld [vmem:[%s5309_s30 + $0x4e8] sm:$0xff] }
  0xf0   : > { %v6051_v26 = vpack.c.bf16 %v443_v49, %v438_v36 }
  0xf6   : > { %1876 = vmatmul.mubr.bf16.gmra.mrb[56].mxu0 %v6041_v56  ;;  %2262 = vmatmul.mubr.bf16.gmra.mrb[88].mxu1 %v5661_v62  ;;  %v290_v62 = vld [vmem:[%s5309_s30 + $0x20] sm:$0xff] }
  0xf7   : > { %1885 = vmatprep.mubr.bf16.mxu0 %v6043_v25  ;;  %2271 = vmatprep.mubr.bf16.mxu1 %v5683_v14  ;;  %v6059_v58 = vpack.c.bf16 %v295_v29, %v290_v62  ;;  %v5084_v14 = vld [vmem:[%s6953_s1 + $0x408] ss:$16 sps:$4 sm:$0xff]  }
  0xfe   : > { %1886 = vmatmul.mubr.bf16.gmra.mrb[60].mxu0 %v6051_v26  ;;  %2272 = vmatmul.mubr.bf16.gmra.mrb[92].mxu1 %v5707_v30  ;;  %v5089_v30 = vld [vmem:[%s6953_s1 + $0x42c] ss:$16 sps:$4 sm:$0xff]  }
  0xff   : > { %1928 = vmatprep.mubr.bf16.mxu0 %v5221_v28  ;;  %2314 = vmatprep.mubr.bf16.mxu1 %v5720_v40  ;;  %v5104_v40 = vld [vmem:[%s6955_s3 + $0x14] ss:$8 sps:$4 sm:$0xff]  }
 0x106   : > { %4093 = vmatmul.mubr.msk.bf16.vlgmr.msra.gmra.mrb[0].mxu0 %vm1448_vm1, %v6059_v58  ;;  %2315 = vmatmul.mubr.bf16.vlgmr.msra.gmra.mrb[32].mxu1 %v5742_v55  ;;  %v5092_v55 = vld [vmem:[%s6953_s1 + $0x44c] ss:$16 sps:$4 sm:$0xff]  }
 0x107   : > { %2476 = vmatpush1.bf16.msra.mxu1 %v5084_v14  ;;  %1938 = vmatprep.mubr.bf16.mxu0 %v5221_v28  ;;  %v5121_v14 = vld [vmem:[%s6955_s3 + $0x64] ss:$8 sps:$4 sm:$0xff]  }
 0x108   : > { %2324 = vmatprep.mubr.bf16.mxu1 %v5750_v0  ;;  %2477 = vmatprep.subr.bf16.mxu1 %v5089_v30  ;;  %v5090_v0 = vld [vmem:[%s6953_s1 + $0x448] ss:$16 sps:$4 sm:$0xff]  }
 0x109   : > { %3129 = vmatpush1.bf16.msra.mxu0 %v5099_v32  ;;  %v5119_v30 = vld [vmem:[%s6955_s3 + $0x60] ss:$8 sps:$4 sm:$0xff]   ;;  %v5124_v32 = vld [vmem:[%s6955_s3 + $0x74] ss:$8 sps:$4 sm:$0xff]  }
 0x10a   : > { %3130 = vmatprep.subr.bf16.mxu0 %v5104_v40  ;;  %v330_v40 = vld [vmem:[%s5309_s30 + $0x160] sm:$0xff] }
 0x10b   : > { %2478 = vmatpush1.bf16.msra.mxu1 %v5087_v46 }
 0x10c   : > { %2479 = vmatprep.subr.bf16.mxu1 %v5092_v55  ;;  %v6184_v55 = vpack.c.bf16 %v335_v37, %v330_v40  ;;  %v5139_v40 = vld [vmem:[%s6955_s3 + $0xc4] ss:$8 sps:$4 sm:$0xff]  }
 0x10d   : > { %3131 = vmatpush1.bf16.msra.mxu0 %v5102_v57  ;;  %v370_v37 = vld [vmem:[%s5309_s30 + $0x2a0] sm:$0xff] }
 0x10e   : > { %4094 = vmatmul.mubr.msk.bf16.gmra.mrb[4].mxu0 %vm1448_vm1, %v6089_v12  ;;  %2325 = vmatmul.mubr.bf16.gmra.mrb[36].mxu1 %v5778_v21  ;;  %v5098_v21 = vld [vmem:[%s6953_s1 + $0x48c] ss:$16 sps:$4 sm:$0xff]  }
 0x10f   : > { %1948 = vmatprep.mubr.bf16.mxu0 %v5221_v28  ;;  %2334 = vmatprep.mubr.bf16.mxu1 %v5780_v22  ;;  %v675_v22 = vld [vmem:[%s6953_s1 + $0x4a8] sm:$0xff] }
 0x110   : > { %2480 = vmatpush1.bf16.msra.mxu1 %v5090_v0  ;;  %3132 = vmatprep.subr.bf16.mxu0 %v5109_v43  ;;  %v4091_v5 = vcombine.high %v675_v22, %v675_v22  ;;  %v4090_v23 = vcombine.low %v675_v22, %v675_v22  ;;  %v5127_v0 = vld [vmem:[%s6955_s3 + $0x84] ss:$8 sps:$4 sm:$0xff]   ;;  %v5125_v43 = vld [vmem:[%s6955_s3 + $0x80] ss:$8 sps:$4 sm:$0xff]  }
 0x111   : > { %2481 = vmatprep.subr.bf16.mxu1 %v5095_v2  ;;  %3133 = vmatpush1.bf16.msra.mxu0 %v5107_v13  ;;  %v5130_v2 = vld [vmem:[%s6955_s3 + $0x94] ss:$8 sps:$4 sm:$0xff]   ;;  %v5133_v22 = vld [vmem:[%s6955_s3 + $0xa4] ss:$8 sps:$4 sm:$0xff]  }
 0x112   : > { %3134 = vmatprep.subr.bf16.mxu0 %v5112_v52  ;;  %v1505_v36 = vsel %vm1497_vm0, %v4090_v23, 0  ;;  %v340_v13 = vld [vmem:[%s5309_s30 + $0x1b0] sm:$0xff]  ;;  %v345_v52 = vld [vmem:[%s5309_s30 + $0x1d8] sm:$0xff] }
 0x114   : > { %2482 = vmatpush1.bf16.msra.mxu1 %v5093_v35  ;;  %v6213_v35 = vpack.c.bf16 %v345_v52, %v340_v13  ;;  %v5142_v52 = vld [vmem:[%s6955_s3 + $0xd4] ss:$8 sps:$4 sm:$0xff]  }
 0x115   : > { %2483 = vmatprep.subr.bf16.mxu1 %v5098_v21  ;;  %3135 = vmatpush1.bf16.msra.mxu0 %v5110_v15  ;;  %v5131_v15 = vld [vmem:[%s6955_s3 + $0xa0] ss:$8 sps:$4 sm:$0xff]  }
 0x116   : > { %4095 = vmatmul.mubr.msk.bf16.gmra.mrb[8].mxu0 %vm1448_vm1, %v6122_v44  ;;  %2335 = vmatmul.mubr.bf16.gmra.mrb[40].mxu1 %v5817_v42  ;;  %v5116_v42 = vld [vmem:[%s6955_s3 + $0x50] ss:$8 sps:$4 sm:$0xff]  }
 0x117   : > { %1958 = vmatprep.mubr.bf16.mxu0 %v5221_v28  ;;  %2344 = vmatprep.mubr.bf16.mxu1 %v5825_v51  ;;  %v6155_v51 = vpack.c.bf16 %v325_v45, %v320_v20  ;;  %v5136_v20 = vld [vmem:[%s6955_s3 + $0xb4] ss:$8 sps:$4 sm:$0xff]  }
 0x118   : > { %2484 = vmatpush1.bf16.msra.mxu1 %v5096_v3  ;;  %3136 = vmatprep.subr.bf16.mxu0 %v5115_v59  ;;  %v350_v3 = vld [vmem:[%s5309_s30 + $0x200] sm:$0xff]  ;;  %v355_v59 = vld [vmem:[%s5309_s30 + $0x228] sm:$0xff]  ;;  %v360_v45 = vld [vmem:[%s5309_s30 + $0x250] sm:$0xff] }
 0x119   : > { %v6146_v17 = vpop.f32.mrb[0].mxu1  ;;  %4109 = vmatprep.subr.msk.bf16.mxu1 %vm1497_vm0, %v4091_v5  ;;  %3137 = vmatpush1.bf16.msra.mxu0 %v5113_v34  ;;  %v6236_v23 = vpack.c.bf16 %v355_v59, %v350_v3 }
 0x11a   : > { %v6153_v49 = vpop.f32.mrb[1].mxu1  ;;  %3138 = vmatprep.subr.bf16.mxu0 %v5118_v7 }
 0x11b   : > { %v6157_v62 = vpop.f32.mrb[2].mxu1 }
 0x11c   : > { %v6159_v29 = vpop.f32.mrb[3].mxu1  ;;  %2486 = vmatpush1.bf16.msra.mxu1 %v1505_v36  ;;  %v365_v36 = vld [vmem:[%s5309_s30 + $0x278] sm:$0xff] }
 0x11d   : > { %3139 = vmatpush1.bf16.msra.mxu0 %v5116_v42 }
 0x11e   : > { %4096 = vmatmul.mubr.msk.bf16.gmra.mrb[12].mxu0 %vm1448_vm1, %v6155_v51  ;;  %2345 = vmatmul.mubr.bf16.gmra.mrb[44].mxu1 %v5846_v8  ;;  %v5122_v8 = vld [vmem:[%s6955_s3 + $0x70] ss:$8 sps:$4 sm:$0xff]  }
 0x11f   : > { %1968 = vmatprep.mubr.bf16.mxu0 %v5221_v28  ;;  %2354 = vmatprep.mubr.bf16.mxu1 %v5848_v9 }
 0x120   : > { %3140 = vmatprep.subr.bf16.mxu0 %v5121_v14  ;;  %v6259_v14 = vpack.c.bf16 %v365_v36, %v360_v45  ;;  %v390_v45 = vld [vmem:[%s5309_s30 + $0x340] sm:$0xff]  ;;  %v395_v36 = vld [vmem:[%s5309_s30 + $0x368] sm:$0xff] }
 0x121   : > { %v6177_v38 = vpop.f32.mrb[4].mxu1  ;;  %3141 = vmatpush1.bf16.msra.mxu0 %v5119_v30 }
 0x122   : > { %v6182_v46 = vpop.f32.mrb[5].mxu1  ;;  %3142 = vmatprep.subr.bf16.mxu0 %v5124_v32 }
 0x123   : > { %v6186_v57 = vpop.f32.mrb[6].mxu1 }
 0x124   : > { %v6188_v9 = vpop.f32.mrb[7].mxu1 }
 0x125   : > { %3143 = vmatpush1.bf16.msra.mxu0 %v5122_v8  ;;  %v375_v8 = vld [vmem:[%s5309_s30 + $0x2c8] sm:$0xff] }
 0x126   : > { %4097 = vmatmul.mubr.msk.bf16.gmra.mrb[16].mxu0 %vm1448_vm1, %v6184_v55  ;;  %2355 = vmatmul.mubr.bf16.gmra.mrb[48].mxu1 %v5870_v27  ;;  %v5128_v27 = vld [vmem:[%s6955_s3 + $0x90] ss:$8 sps:$4 sm:$0xff]  }
 0x127   : > { %1978 = vmatprep.mubr.bf16.mxu0 %v5221_v28  ;;  %2364 = vmatprep.mubr.bf16.mxu1 %v5872_v47 }
 0x128   : > { %3144 = vmatprep.subr.bf16.mxu0 %v5127_v0 }
 0x129   : > { %v6206_v53 = vpop.f32.mrb[8].mxu1  ;;  %3145 = vmatpush1.bf16.msra.mxu0 %v5125_v43  ;;  %v6282_v43 = vpack.c.bf16 %v375_v8, %v370_v37 }
 0x12a   : > { %v6211_v24 = vpop.f32.mrb[9].mxu1  ;;  %3146 = vmatprep.subr.bf16.mxu0 %v5130_v2 }
 0x12b   : > { %v6215_v21 = vpop.f32.mrb[10].mxu1 }
 0x12c   : > { %v6217_v47 = vpop.f32.mrb[11].mxu1 }
 0x12d   : > { %3147 = vmatpush1.bf16.msra.mxu0 %v5128_v27  ;;  %v380_v27 = vld [vmem:[%s5309_s30 + $0x2f0] sm:$0xff] }
 0x12e   : > { %4098 = vmatmul.mubr.msk.bf16.gmra.mrb[20].mxu0 %vm1448_vm1, %v6213_v35  ;;  %2365 = vmatmul.mubr.bf16.gmra.mrb[52].mxu1 %v5894_v41 }
 0x12f   : > { %1988 = vmatprep.mubr.bf16.mxu0 %v5221_v28  ;;  %2374 = vmatprep.mubr.bf16.mxu1 %v5896_v6  ;;  %v5134_v6 = vld [vmem:[%s6955_s3 + $0xb0] ss:$8 sps:$4 sm:$0xff]  }
 0x130   : > { %3148 = vmatprep.subr.bf16.mxu0 %v5133_v22 }
 0x131   : > { %v6232_v5 = vpop.f32.mrb[12].mxu1  ;;  %3149 = vmatpush1.bf16.msra.mxu0 %v5131_v15  ;;  %v385_v15 = vld [vmem:[%s5309_s30 + $0x318] sm:$0xff] }
 0x132   : > { %v6234_v41 = vpop.f32.mrb[13].mxu1  ;;  %3150 = vmatprep.subr.bf16.mxu0 %v5136_v20  ;;  %v6305_v3 = vpack.c.bf16 %v385_v15, %v380_v27  ;;  %v5145_v20 = vld [vmem:[%s6955_s3 + $0xe4] ss:$8 sps:$4 sm:$0xff]   ;;  %v5148_v27 = vld [vmem:[%s6955_s3 + $0xf4] ss:$8 sps:$4 sm:$0xff]  }
 0x133   : > { %v6238_v34 = vpop.f32.mrb[14].mxu1  ;;  %v5146_v15 = vld [vmem:[%s6955_s3 + $0xf0] ss:$8 sps:$4 sm:$0xff]  }
 0x134   : > { %v6240_v7 = vpop.f32.mrb[15].mxu1 }
 0x135   : > { %3151 = vmatpush1.bf16.msra.mxu0 %v5134_v6 }
 0x136   : > { %4099 = vmatmul.mubr.msk.bf16.gmra.mrb[24].mxu0 %vm1448_vm1, %v6236_v23  ;;  %2375 = vmatmul.mubr.bf16.gmra.mrb[56].mxu1 %v5918_v33 }
 0x137   : > { %1998 = vmatprep.mubr.bf16.mxu0 %v5221_v28  ;;  %2384 = vmatprep.mubr.bf16.mxu1 %v5920_v63  ;;  %v5137_v63 = vld [vmem:[%s6955_s3 + $0xc0] ss:$8 sps:$4 sm:$0xff]  }
 0x138   : > { %3152 = vmatprep.subr.bf16.mxu0 %v5139_v40  ;;  %v6328_v40 = vpack.c.bf16 %v395_v36, %v390_v45  ;;  %v435_v36 = vld [vmem:[%s5309_s30 + $0x4a8] sm:$0xff] }
 0x139   : > { %v6255_v42 = vpop.f32.mrb[16].mxu1  ;;  %3153 = vmatpush1.bf16.msra.mxu0 %v5137_v63 }
 0x13a   : > { %v6257_v33 = vpop.f32.mrb[17].mxu1  ;;  %3154 = vmatprep.subr.bf16.mxu0 %v5142_v52 }
 0x13b   : > { %v6261_v30 = vpop.f32.mrb[18].mxu1 }
 0x13c   : > { %v6263_v32 = vpop.f32.mrb[19].mxu1 }
 0x13e   : > { %4100 = vmatmul.mubr.msk.bf16.gmra.mrb[28].mxu0 %vm1448_vm1, %v6259_v14  ;;  %2385 = vmatmul.mubr.bf16.gmra.mrb[60].mxu1 %v5942_v10 }
 0x13f   : > { %2008 = vmatprep.mubr.bf16.mxu0 %v5221_v28  ;;  %2394 = vmatprep.mubr.bf16.mxu1 %v5944_v11  ;;  %v5140_v11 = vld [vmem:[%s6955_s3 + $0xd0] ss:$8 sps:$4 sm:$0xff]  }
 0x140   : > { %3155 = vmatpush1.bf16.msra.mxu0 %v5140_v11  ;;  %v405_v11 = vld [vmem:[%s5309_s30 + $0x3b8] sm:$0xff] }
 0x141   : > { %v6278_v0 = vpop.f32.mrb[20].mxu1  ;;  %3156 = vmatprep.subr.bf16.mxu0 %v5145_v20  ;;  %v5151_v20 = vld [vmem:[%s6955_s3 + $0x104] ss:$8 sps:$4 sm:$0xff]  }
 0x142   : > { %v6280_v10 = vpop.f32.mrb[21].mxu1 }
 0x143   : > { %v6284_v2 = vpop.f32.mrb[22].mxu1 }
 0x144   : > { %v6286_v13 = vpop.f32.mrb[23].mxu1 }
 0x146   : > { %4101 = vmatmul.mubr.msk.bf16.gmra.mrb[32].mxu0 %vm1448_vm1, %v6282_v43  ;;  %2395 = vmatmul.mubr.bf16.gmra.mrb[64].mxu1 %v5966_v31 }
 0x147   : > { %2018 = vmatprep.mubr.bf16.mxu0 %v5221_v28  ;;  %2404 = vmatprep.mubr.bf16.mxu1 %v5968_v19  ;;  %v5143_v19 = vld [vmem:[%s6955_s3 + $0xe0] ss:$8 sps:$4 sm:$0xff]  }
 0x148   : > { %3157 = vmatpush1.bf16.msra.mxu0 %v5143_v19 }
 0x149   : > { %v6301_v22 = vpop.f32.mrb[24].mxu1  ;;  %3158 = vmatprep.subr.bf16.mxu0 %v5148_v27 }
 0x14a   : > { %v6303_v31 = vpop.f32.mrb[25].mxu1 }
 0x14b   : > { %v6307_v59 = vpop.f32.mrb[26].mxu1 }
 0x14c   : > { %v6309_v6 = vpop.f32.mrb[27].mxu1  ;;  %3159 = vmatpush1.bf16.msra.mxu0 %v5146_v15 }
 0x14d   : > { %3321 = vmatprep.subr.bf16.mxu0 %v5151_v20 }
 0x14e   : > { %4102 = vmatmul.mubr.msk.bf16.gmra.mrb[36].mxu0 %vm1448_vm1, %v6305_v3  ;;  %2405 = vmatmul.mubr.bf16.gmra.mrb[68].mxu1 %v5978_v39 }
 0x14f   : > { %2028 = vmatprep.mubr.bf16.mxu0 %v5221_v28  ;;  %2414 = vmatprep.mubr.bf16.mxu1 %v5980_v1  ;;  %v400_v1 = vld [vmem:[%s5309_s30 + $0x390] sm:$0xff] }
 0x150   : > { %v6341_v52 = vpack.c.bf16 %v405_v11, %v400_v1  ;;  %v445_v11 = vld [vmem:[%s5309_s30 + $0x4f8] sm:$0xff] }
 0x151   : > { %v6324_v63 = vpop.f32.mrb[28].mxu1 }
 0x152   : > { %v6326_v39 = vpop.f32.mrb[29].mxu1 }
 0x153   : > { %v6330_v37 = vpop.f32.mrb[30].mxu1 }
 0x154   : > { %v6332_v8 = vpop.f32.mrb[31].mxu1 }
 0x156   : > { %4103 = vmatmul.mubr.msk.bf16.gmra.mrb[40].mxu0 %vm1448_vm1, %v6328_v40  ;;  %2415 = vmatmul.mubr.bf16.gmra.mrb[72].mxu1 %v5990_v18  ;;  %v410_v18 = vld [vmem:[%s5309_s30 + $0x3e0] sm:$0xff] }
 0x157   : > { %2038 = vmatprep.mubr.bf16.mxu0 %v5221_v28  ;;  %2424 = vmatprep.mubr.bf16.mxu1 %v5992_v50  ;;  %v415_v50 = vld [vmem:[%s5309_s30 + $0x408] sm:$0xff] }
 0x158   : > { %v6356_v19 = vpack.c.bf16 %v415_v50, %v410_v18  ;;  %v5149_v18 = vld [vmem:[%s6955_s3 + $0x100] ss:$8 sps:$4 sm:$0xff]   ;;  %v5154_v50 = vld [vmem:[%s6955_s3 + $0x114] ss:$8 sps:$4 sm:$0xff]  }
 0x15e   : > { %4104 = vmatmul.mubr.msk.bf16.gmra.mrb[44].mxu0 %vm1448_vm1, %v6341_v52  ;;  %2425 = vmatmul.mubr.bf16.gmra.mrb[76].mxu1 %v6002_v54  ;;  %v420_v54 = vld [vmem:[%s5309_s30 + $0x430] sm:$0xff] }
 0x15f   : > { %2048 = vmatprep.mubr.bf16.mxu0 %v5221_v28  ;;  %2434 = vmatprep.mubr.bf16.mxu1 %v6004_v60  ;;  %v425_v60 = vld [vmem:[%s5309_s30 + $0x458] sm:$0xff] }
 0x160   : > { %v6368_v45 = vpack.c.bf16 %v425_v60, %v420_v54 }
 0x166   : > { %4105 = vmatmul.mubr.msk.bf16.gmra.mrb[48].mxu0 %vm1448_vm1, %v6356_v19  ;;  %2435 = vmatmul.mubr.bf16.gmra.mrb[80].mxu1 %v6017_v4  ;;  %v430_v4 = vld [vmem:[%s5309_s30 + $0x480] sm:$0xff] }
 0x167   : > { %2058 = vmatprep.mubr.bf16.mxu0 %v5221_v28  ;;  %2444 = vmatprep.mubr.bf16.mxu1 %v6019_v48  ;;  %v6377_v1 = vpack.c.bf16 %v435_v36, %v430_v4  ;;  %v440_v48 = vld [vmem:[%s5309_s30 + $0x4d0] sm:$0xff] }
 0x16e   : > { %4106 = vmatmul.mubr.msk.bf16.gmra.mrb[52].mxu0 %vm1448_vm1, %v6368_v45  ;;  %2445 = vmatmul.mubr.bf16.gmra.mrb[84].mxu1 %v6029_v61  ;;  %v6386_v61 = vpack.c.bf16 %v445_v11, %v440_v48  ;;  %v5157_v11 = vld [vmem:[%s6955_s3 + $0x124] ss:$8 sps:$4 sm:$0xff]  }
 0x16f   : > { %2068 = vmatprep.mubr.bf16.mxu0 %v5221_v28  ;;  %2454 = vmatprep.mubr.bf16.mxu1 %v6031_v16  ;;  %v678_v16 = vlaneseq }
 0x176   : > { %4107 = vmatmul.mubr.msk.bf16.gmra.mrb[56].mxu0 %vm1448_vm1, %v6377_v1  ;;  %2455 = vmatmul.mubr.bf16.gmra.mrb[88].mxu1 %v6041_v56  ;;  %v6422_v56 = vshrl.u32 %v678_v16, 7 }
 0x177   : > { %2078 = vmatprep.mubr.bf16.mxu0 %v5221_v28  ;;  %2464 = vmatprep.mubr.bf16.mxu1 %v6043_v25 }
 0x178   : > { %v680_v25 = vsub.s32 0, %v6422_v56 }
 0x17e   : > { %4108 = vmatmul.mubr.msk.bf16.gmra.mrb[60].mxu0 %vm1448_vm1, %v6386_v61  ;;  %2465 = vmatmul.mubr.bf16.gmra.mrb[92].mxu1 %v6051_v26  ;;  %v6430_v26 = vld [vmem:[%s6954_s2] sm:$0xf] }
 0x17f   : > { %2507 = vmatprep.mubr.bf16.mxu1 %v5221_v28 }
 0x186   : > { %4110 = vmatmul.mubr.msk.bf16.vlgmr.msra.gmra.mrb[32].mxu1 %vm1448_vm1, %v6059_v58  ;;  %v684_v58 = vsub.s32 1, %v6422_v56 }
 0x187   : > { %2517 = vmatprep.mubr.bf16.mxu1 %v5221_v28 }
 0x18e   : > { %4111 = vmatmul.mubr.msk.bf16.gmra.mrb[36].mxu1 %vm1448_vm1, %v6089_v12 }
 0x18f   : > { %2527 = vmatprep.mubr.bf16.mxu1 %v5221_v28 }
 0x196   : > { %4112 = vmatmul.mubr.msk.bf16.gmra.mrb[40].mxu1 %vm1448_vm1, %v6122_v44  ;;  %v6437_v44 = vrot.slane %v6430_v26, %v680_v25 }
 0x197   : > { %2537 = vmatprep.mubr.bf16.mxu1 %v5221_v28 }
 0x19e   : > { %4113 = vmatmul.mubr.msk.bf16.gmra.mrb[44].mxu1 %vm1448_vm1, %v6155_v51 }
 0x19f   : > { %2547 = vmatprep.mubr.bf16.mxu1 %v5221_v28 }
 0x1a6   : > { %4114 = vmatmul.mubr.msk.bf16.gmra.mrb[48].mxu1 %vm1448_vm1, %v6184_v55  ;;  %v6442_v55 = vrot.slane %v6430_v26, %v684_v58 }
 0x1a7   : > { %2557 = vmatprep.mubr.bf16.mxu1 %v5221_v28 }
 0x1ae   : > { %4115 = vmatmul.mubr.msk.bf16.gmra.mrb[52].mxu1 %vm1448_vm1, %v6213_v35 }
 0x1af   : > { %2567 = vmatprep.mubr.bf16.mxu1 %v5221_v28 }
 0x1b6   : > { %4116 = vmatmul.mubr.msk.bf16.gmra.mrb[56].mxu1 %vm1448_vm1, %v6236_v23 }
 0x1b7   : > { %2577 = vmatprep.mubr.bf16.mxu1 %v5221_v28 }
 0x1be   : > { %4117 = vmatmul.mubr.msk.bf16.gmra.mrb[60].mxu1 %vm1448_vm1, %v6259_v14 }
 0x1bf   : > { %2587 = vmatprep.mubr.bf16.mxu1 %v5221_v28 }
 0x1c6   : > { %4118 = vmatmul.mubr.msk.bf16.gmra.mrb[64].mxu1 %vm1448_vm1, %v6282_v43 }
 0x1c7   : > { %2597 = vmatprep.mubr.bf16.mxu1 %v5221_v28 }
 0x1ce   : > { %4119 = vmatmul.mubr.msk.bf16.gmra.mrb[68].mxu1 %vm1448_vm1, %v6305_v3 }
 0x1cf   : > { %2607 = vmatprep.mubr.bf16.mxu1 %v5221_v28 }
 0x1d6   : > { %4120 = vmatmul.mubr.msk.bf16.gmra.mrb[72].mxu1 %vm1448_vm1, %v6328_v40 }
 0x1d7   : > { %2617 = vmatprep.mubr.bf16.mxu1 %v5221_v28 }
 0x1d9   : > { %v1930_v12 = vpop.f32.mrb[0].mxu0 }
 0x1da   : > { %v1932_v51 = vpop.f32.mrb[1].mxu0  ;;  %v4353_v23 = vadd.f32 %v1930_v12, %v6437_v44 }
 0x1db   : > { %v1934_v35 = vpop.f32.mrb[2].mxu0  ;;  %v4354_v3 = vadd.f32 %v1932_v51, %v6442_v55 }
 0x1dc   : > { %v4355_v14 = vadd.f32 %v1934_v35, %v6437_v44  ;;  %v1936_v43 = vpop.f32.mrb[3].mxu0 }
 0x1dd   : > { %v4356_v40 = vadd.f32 %v1936_v43, %v6442_v55 }
 0x1de   : > { %v2668_v27 = vpack.c.bf16 %v4355_v14, %v4353_v23  ;;  %4121 = vmatmul.mubr.msk.bf16.gmra.mrb[76].mxu1 %vm1448_vm1, %v6341_v52  ;;  %v5152_v52 = vld [vmem:[%s6955_s3 + $0x110] ss:$8 sps:$4 sm:$0xff]   ;;  %v5155_v23 = vld [vmem:[%s6955_s3 + $0x120] ss:$8 sps:$4 sm:$0xff]   ;;  %v5160_v14 = vld [vmem:[%s6955_s3 + $0x134] ss:$8 sps:$4 sm:$0xff]  }
 0x1df   : > { %v2669_v15 = vpack.c.bf16 %v4356_v40, %v4354_v3  ;;  %2627 = vmatprep.mubr.bf16.mxu1 %v5221_v28 }
 0x1e1   : > { %v1940_v20 = vpop.f32.mrb[4].mxu0  ;;  %3160 = vmatprep.mubr.bf16.mxu0 %v2669_v15 }
 0x1e2   : > { %v1942_v54 = vpop.f32.mrb[5].mxu0  ;;  %3161 = vmatmul.mubr.bf16.vlgmr.msra.gmra.mrb[64].mxu0 %v2668_v27  ;;  %v4357_v4 = vadd.f32 %v1940_v20, %v6437_v44 }
 0x1e3   : > { %v1944_v60 = vpop.f32.mrb[6].mxu0  ;;  %3322 = vmatpush1.bf16.msra.mxu0 %v5149_v18  ;;  %v4358_v16 = vadd.f32 %v1942_v54, %v6442_v55 }
 0x1e4   : > { %v4359_v36 = vadd.f32 %v1944_v60, %v6437_v44  ;;  %v1946_v48 = vpop.f32.mrb[7].mxu0  ;;  %3323 = vmatprep.subr.bf16.mxu0 %v5154_v50  ;;  %v5163_v50 = vld [vmem:[%s6955_s3 + $0x144] ss:$8 sps:$4 sm:$0xff]  }
 0x1e5   : > { %v4360_v12 = vadd.f32 %v1946_v48, %v6442_v55 }
 0x1e6   : > { %v2672_v51 = vpack.c.bf16 %v4359_v36, %v4357_v4  ;;  %4122 = vmatmul.mubr.msk.bf16.gmra.mrb[80].mxu1 %vm1448_vm1, %v6356_v19  ;;  %v5158_v19 = vld [vmem:[%s6955_s3 + $0x130] ss:$8 sps:$4 sm:$0xff]   ;;  %v5161_v4 = vld [vmem:[%s6955_s3 + $0x140] ss:$8 sps:$4 sm:$0xff]   ;;  %v5166_v36 = vld [vmem:[%s6955_s3 + $0x154] ss:$8 sps:$4 sm:$0xff]  }
 0x1e7   : > { %v2673_v35 = vpack.c.bf16 %v4360_v12, %v4358_v16  ;;  %3324 = vmatpush1.bf16.msra.mxu0 %v5152_v52  ;;  %2637 = vmatprep.mubr.bf16.mxu1 %v5221_v28 }
 0x1e8   : > { %3325 = vmatprep.subr.bf16.mxu0 %v5157_v11 }
 0x1e9   : > { %v1950_v43 = vpop.f32.mrb[8].mxu0  ;;  %3170 = vmatprep.mubr.bf16.mxu0 %v2673_v35 }
 0x1ea   : > { %v1952_v3 = vpop.f32.mrb[9].mxu0  ;;  %3171 = vmatmul.mubr.bf16.gmra.mrb[68].mxu0 %v2672_v51  ;;  %v4361_v27 = vadd.f32 %v1950_v43, %v6437_v44 }
 0x1eb   : > { %v1954_v40 = vpop.f32.mrb[10].mxu0  ;;  %3326 = vmatpush1.bf16.msra.mxu0 %v5155_v23  ;;  %v4362_v20 = vadd.f32 %v1952_v3, %v6442_v55  ;;  %v5169_v23 = vld [vmem:[%s6955_s3 + $0x164] ss:$8 sps:$4 sm:$0xff]  }
 0x1ec   : > { %v4363_v15 = vadd.f32 %v1954_v40, %v6437_v44  ;;  %v1956_v18 = vpop.f32.mrb[11].mxu0  ;;  %3327 = vmatprep.subr.bf16.mxu0 %v5160_v14 }
 0x1ed   : > { %v4364_v54 = vadd.f32 %v1956_v18, %v6442_v55 }
 0x1ee   : > { %v2676_v60 = vpack.c.bf16 %v4363_v15, %v4361_v27  ;;  %4123 = vmatmul.mubr.msk.bf16.gmra.mrb[84].mxu1 %vm1448_vm1, %v6368_v45  ;;  %v5164_v45 = vld [vmem:[%s6955_s3 + $0x150] ss:$8 sps:$4 sm:$0xff]   ;;  %v5172_v27 = vld [vmem:[%s6955_s3 + $0x174] ss:$8 sps:$4 sm:$0xff]  }
 0x1ef   : > { %v2677_v52 = vpack.c.bf16 %v4364_v54, %v4362_v20  ;;  %2647 = vmatprep.mubr.bf16.mxu1 %v5221_v28  ;;  %3328 = vmatpush1.bf16.msra.mxu0 %v5158_v19  ;;  %v5167_v19 = vld [vmem:[%s6955_s3 + $0x160] ss:$8 sps:$4 sm:$0xff]  }
 0x1f0   : > { %3329 = vmatprep.subr.bf16.mxu0 %v5163_v50 }
 0x1f1   : > { %v1960_v48 = vpop.f32.mrb[12].mxu0  ;;  %3180 = vmatprep.mubr.bf16.mxu0 %v2677_v52 }
 0x1f2   : > { %v1962_v11 = vpop.f32.mrb[13].mxu0  ;;  %3181 = vmatmul.mubr.bf16.gmra.mrb[72].mxu0 %v2676_v60  ;;  %v4365_v12 = vadd.f32 %v1960_v48, %v6437_v44  ;;  %v5175_v60 = vld [vmem:[%s6955_s3 + $0x184] ss:$8 sps:$4 sm:$0xff]  }
 0x1f3   : > { %v1964_v16 = vpop.f32.mrb[14].mxu0  ;;  %3330 = vmatpush1.bf16.msra.mxu0 %v5161_v4  ;;  %v4366_v14 = vadd.f32 %v1962_v11, %v6442_v55  ;;  %v5173_v11 = vld [vmem:[%s6955_s3 + $0x180] ss:$8 sps:$4 sm:$0xff]  }
 0x1f4   : > { %v4367_v51 = vadd.f32 %v1964_v16, %v6437_v44  ;;  %v1966_v35 = vpop.f32.mrb[15].mxu0  ;;  %3331 = vmatprep.subr.bf16.mxu0 %v5166_v36  ;;  %v5178_v16 = vld [vmem:[%s6955_s3 + $0x194] ss:$8 sps:$4 sm:$0xff]  }
 0x1f5   : > { %v4368_v43 = vadd.f32 %v1966_v35, %v6442_v55 }
 0x1f6   : > { %v2680_v3 = vpack.c.bf16 %v4367_v51, %v4365_v12  ;;  %4124 = vmatmul.mubr.msk.bf16.gmra.mrb[88].mxu1 %vm1448_vm1, %v6377_v1 }
 0x1f7   : > { %v2681_v40 = vpack.c.bf16 %v4368_v43, %v4366_v14  ;;  %2657 = vmatprep.mubr.bf16.mxu1 %v5221_v28  ;;  %3332 = vmatpush1.bf16.msra.mxu0 %v5164_v45  ;;  %v5170_v28 = vld [vmem:[%s6955_s3 + $0x170] ss:$8 sps:$4 sm:$0xff]   ;;  %v5181_v43 = vld [vmem:[%s6955_s3 + $0x1a4] ss:$8 sps:$4 sm:$0xff]  }
 0x1f8   : > { %3333 = vmatprep.subr.bf16.mxu0 %v5169_v23 }
 0x1f9   : > { %v1970_v15 = vpop.f32.mrb[16].mxu0  ;;  %3190 = vmatprep.mubr.bf16.mxu0 %v2681_v40 }
 0x1fa   : > { %v1972_v18 = vpop.f32.mrb[17].mxu0  ;;  %3191 = vmatmul.mubr.bf16.gmra.mrb[76].mxu0 %v2680_v3  ;;  %v4369_v1 = vadd.f32 %v1970_v15, %v6437_v44  ;;  %v5179_v15 = vld [vmem:[%s6955_s3 + $0x1a0] ss:$8 sps:$4 sm:$0xff]  }
 0x1fb   : > { %v1974_v50 = vpop.f32.mrb[18].mxu0  ;;  %3334 = vmatpush1.bf16.msra.mxu0 %v5167_v19  ;;  %v4370_v52 = vadd.f32 %v1972_v18, %v6442_v55  ;;  %v5184_v18 = vld [vmem:[%s6955_s3 + $0x1b4] ss:$8 sps:$4 sm:$0xff]  }
 0x1fc   : > { %v4371_v20 = vadd.f32 %v1974_v50, %v6437_v44  ;;  %v1976_v54 = vpop.f32.mrb[19].mxu0  ;;  %3335 = vmatprep.subr.bf16.mxu0 %v5172_v27 }
 0x1fd   : > { %v4372_v4 = vadd.f32 %v1976_v54, %v6442_v55 }
 0x1fe   : > { %v2684_v36 = vpack.c.bf16 %v4371_v20, %v4369_v1  ;;  %4125 = vmatmul.mubr.msk.bf16.gmra.mrb[92].mxu1 %vm1448_vm1, %v6386_v61  ;;  %v5176_v61 = vld [vmem:[%s6955_s3 + $0x190] ss:$8 sps:$4 sm:$0xff]  }
 0x1ff   : > { %v2685_v48 = vpack.c.bf16 %v4372_v4, %v4370_v52  ;;  %3336 = vmatpush1.bf16.msra.mxu0 %v5170_v28  ;;  %v5182_v20 = vld [vmem:[%s6955_s3 + $0x1b0] ss:$8 sps:$4 sm:$0xff]   ;;  %v5187_v4 = vld [vmem:[%s6955_s3 + $0x1c4] ss:$8 sps:$4 sm:$0xff]  }
 0x200   : > { %3337 = vmatprep.subr.bf16.mxu0 %v5175_v60 }
 0x201   : > { %v1980_v45 = vpop.f32.mrb[20].mxu0  ;;  %3200 = vmatprep.mubr.bf16.mxu0 %v2685_v48 }
 0x202   : > { %v1982_v12 = vpop.f32.mrb[21].mxu0  ;;  %3201 = vmatmul.mubr.bf16.gmra.mrb[80].mxu0 %v2684_v36  ;;  %v4373_v35 = vadd.f32 %v1980_v45, %v6437_v44  ;;  %v5185_v45 = vld [vmem:[%s6955_s3 + $0x1c0] ss:$8 sps:$4 sm:$0xff]  }
 0x203   : > { %v1984_v51 = vpop.f32.mrb[22].mxu0  ;;  %3338 = vmatpush1.bf16.msra.mxu0 %v5173_v11  ;;  %v4374_v3 = vadd.f32 %v1982_v12, %v6442_v55  ;;  %v5190_v12 = vld [vmem:[%s6955_s3 + $0x1d4] ss:$8 sps:$4 sm:$0xff]  }
 0x204   : > { %v4375_v23 = vadd.f32 %v1984_v51, %v6437_v44  ;;  %v1986_v14 = vpop.f32.mrb[23].mxu0  ;;  %3339 = vmatprep.subr.bf16.mxu0 %v5178_v16 }
 0x205   : > { %v4376_v40 = vadd.f32 %v1986_v14, %v6442_v55 }
 0x206   : > { %v2688_v19 = vpack.c.bf16 %v4375_v23, %v4373_v35  ;;  %v5188_v23 = vld [vmem:[%s6955_s3 + $0x1d0] ss:$8 sps:$4 sm:$0xff]  }
 0x207   : > { %v2689_v27 = vpack.c.bf16 %v4376_v40, %v4374_v3  ;;  %3340 = vmatpush1.bf16.msra.mxu0 %v5176_v61  ;;  %v5193_v40 = vld [vmem:[%s6955_s3 + $0x1e4] ss:$8 sps:$4 sm:$0xff]  }
 0x208   : > { %3341 = vmatprep.subr.bf16.mxu0 %v5181_v43 }
 0x209   : > { %v1990_v50 = vpop.f32.mrb[24].mxu0  ;;  %3210 = vmatprep.mubr.bf16.mxu0 %v2689_v27 }
 0x20a   : > { %v1992_v28 = vpop.f32.mrb[25].mxu0  ;;  %3211 = vmatmul.mubr.bf16.gmra.mrb[84].mxu0 %v2688_v19  ;;  %v4377_v54 = vadd.f32 %v1990_v50, %v6437_v44  ;;  %v5191_v50 = vld [vmem:[%s6955_s3 + $0x1e0] ss:$8 sps:$4 sm:$0xff]  }
 0x20b   : > { %v1994_v1 = vpop.f32.mrb[26].mxu0  ;;  %3342 = vmatpush1.bf16.msra.mxu0 %v5179_v15  ;;  %v4378_v36 = vadd.f32 %v1992_v28, %v6442_v55  ;;  %v1625_v28 = vadd.f32 %v6146_v17, %v6437_v44 }
 0x20c   : > { %v4379_v60 = vadd.f32 %v1994_v1, %v6437_v44  ;;  %v1996_v52 = vpop.f32.mrb[27].mxu0  ;;  %3343 = vmatprep.subr.bf16.mxu0 %v5184_v18  ;;  %v5196_v1 = vld [vmem:[%s6955_s3 + $0x1f4] ss:$8 sps:$4 sm:$0xff]  }
 0x20d   : > { %v4380_v48 = vadd.f32 %v1996_v52, %v6442_v55 }
 0x20e   : > { %v2692_v11 = vpack.c.bf16 %v4379_v60, %v4377_v54  ;;  %v1629_v60 = vadd.f32 %v6157_v62, %v6437_v44  ;;  %v1635_v62 = vadd.f32 %v6177_v38, %v6437_v44 }
 0x20f   : > { %v2693_v16 = vpack.c.bf16 %v4380_v48, %v4378_v36  ;;  %3344 = vmatpush1.bf16.msra.mxu0 %v5182_v20  ;;  %v1627_v20 = vadd.f32 %v6153_v49, %v6442_v55  ;;  %v1631_v36 = vadd.f32 %v6159_v29, %v6442_v55  ;;  %v1637_v29 = vadd.f32 %v6182_v46, %v6442_v55 }
 0x210   : > { %3345 = vmatprep.subr.bf16.mxu0 %v5187_v4  ;;  %v1645_v46 = vadd.f32 %v6206_v53, %v6437_v44 }
 0x211   : > { %v2000_v51 = vpop.f32.mrb[28].mxu0  ;;  %3220 = vmatprep.mubr.bf16.mxu0 %v2693_v16 }
 0x212   : > { %v2002_v61 = vpop.f32.mrb[29].mxu0  ;;  %3221 = vmatmul.mubr.bf16.gmra.mrb[88].mxu0 %v2692_v11  ;;  %v4381_v14 = vadd.f32 %v2000_v51, %v6437_v44  ;;  %v5194_v11 = vld [vmem:[%s6955_s3 + $0x1f0] ss:$8 sps:$4 sm:$0xff]  }
 0x213   : > { %v2004_v35 = vpop.f32.mrb[30].mxu0  ;;  %3346 = vmatpush1.bf16.msra.mxu0 %v5185_v45  ;;  %v4382_v19 = vadd.f32 %v2002_v61, %v6442_v55 }
 0x214   : > { %v4383_v43 = vadd.f32 %v2004_v35, %v6437_v44  ;;  %v2006_v3 = vpop.f32.mrb[31].mxu0  ;;  %3347 = vmatprep.subr.bf16.mxu0 %v5190_v12  ;;  %v1639_v35 = vadd.f32 %v6186_v57, %v6437_v44 }
 0x215   : > { %v4384_v27 = vadd.f32 %v2006_v3, %v6442_v55 }
 0x216   : > { %v2696_v15 = vpack.c.bf16 %v4383_v43, %v4381_v14  ;;  %v1641_v43 = vadd.f32 %v6188_v9, %v6442_v55 }
 0x217   : > { %v2697_v18 = vpack.c.bf16 %v4384_v27, %v4382_v19  ;;  %3348 = vmatpush1.bf16.msra.mxu0 %v5188_v23 }
 0x218   : > { %3349 = vmatprep.subr.bf16.mxu0 %v5193_v40 }
 0x219   : > { %v2010_v54 = vpop.f32.mrb[32].mxu0  ;;  %3230 = vmatprep.mubr.bf16.mxu0 %v2697_v18 }
 0x21a   : > { %v4386_v52 = vadd.f32 %v2010_v54, %v1625_v28  ;;  %v2012_v4 = vpop.f32.mrb[33].mxu0  ;;  %3231 = vmatmul.mubr.bf16.gmra.mrb[92].mxu0 %v2696_v15  ;;  %v1649_v28 = vadd.f32 %v6215_v21, %v6437_v44 }
 0x21b   : > { %v4388_v17 = vadd.f32 %v2012_v4, %v1627_v20  ;;  %v2014_v48 = vpop.f32.mrb[34].mxu0  ;;  %3350 = vmatpush1.bf16.msra.mxu0 %v5191_v50  ;;  %v1647_v50 = vadd.f32 %v6211_v24, %v6442_v55  ;;  %v1651_v20 = vadd.f32 %v6217_v47, %v6442_v55  ;;  %v1655_v24 = vadd.f32 %v6232_v5, %v6437_v44 }
 0x21c   : > { %v4390_v16 = vadd.f32 %v2014_v48, %v1629_v60  ;;  %v2016_v49 = vpop.f32.mrb[35].mxu0  ;;  %3351 = vmatprep.subr.bf16.mxu0 %v5196_v1  ;;  %v1657_v48 = vadd.f32 %v6234_v41, %v6442_v55  ;;  %v1665_v41 = vadd.f32 %v6255_v42, %v6437_v44 }
 0x21d   : > { %v4392_v45 = vadd.f32 %v2016_v49, %v1631_v36  ;;  %v1661_v49 = vadd.f32 %v6240_v7, %v6442_v55 }
 0x21e   : > { %v2700_v12 = vpack.c.bf16 %v4390_v16, %v4386_v52 }
 0x21f   : > { %v2701_v51 = vpack.c.bf16 %v4392_v45, %v4388_v17  ;;  %3352 = vmatpush1.bf16.msra.mxu0 %v5194_v11  ;;  %v1659_v11 = vadd.f32 %v6238_v34, %v6437_v44 }
 0x221   : > { %v2020_v61 = vpop.f32.mrb[36].mxu0  ;;  %3240 = vmatprep.mubr.bf16.mxu0 %v2701_v51 }
 0x222   : > { %v4394_v23 = vadd.f32 %v2020_v61, %v1635_v62  ;;  %v2022_v14 = vpop.f32.mrb[37].mxu0  ;;  %3241 = vmatmul.mubr.bf16.gmra.mrb[96].mxu0 %v2700_v12 }
 0x223   : > { %v4396_v3 = vadd.f32 %v2022_v14, %v1637_v29  ;;  %v2024_v40 = vpop.f32.mrb[38].mxu0 }
 0x224   : > { %v4398_v19 = vadd.f32 %v2024_v40, %v1639_v35  ;;  %v2026_v27 = vpop.f32.mrb[39].mxu0  ;;  %v1667_v35 = vadd.f32 %v6257_v33, %v6442_v55  ;;  %v5197_v33 = vld [vmem:[%s6957_s5 + $0x40] sm:$0xff]  }
 0x225   : > { %v4400_v15 = vadd.f32 %v2026_v27, %v1641_v43  ;;  %v1671_v43 = vadd.f32 %v6263_v32, %v6442_v55  ;;  %v1677_v32 = vadd.f32 %v6280_v10, %v6442_v55  ;;  %4209 = vmatprep.subr.bf16.mxu1 %v5197_v33  ;;  %v5204_v33 = vld [vmem:[%s6957_s5 + $0x18] sm:$0xff]  }
 0x226   : > { %v2704_v38 = vpack.c.bf16 %v4398_v19, %v4394_v23  ;;  %v1669_v23 = vadd.f32 %v6261_v30, %v6437_v44  ;;  %v5198_v30 = vld [vmem:[%s6957_s5] sm:$0xff]  }
 0x227   : > { %v2705_v18 = vpack.c.bf16 %v4400_v15, %v4396_v3  ;;  %4210 = vmatpush3.bf16.msra.mxu1 %v5198_v30 }
 0x229   : > { %v2030_v57 = vpop.f32.mrb[40].mxu0  ;;  %3250 = vmatprep.mubr.bf16.mxu0 %v2705_v18  ;;  %v1675_v18 = vadd.f32 %v6278_v0, %v6437_v44 }
 0x22a   : > { %v4402_v1 = vadd.f32 %v2030_v57, %v1645_v46  ;;  %v2032_v9 = vpop.f32.mrb[41].mxu0  ;;  %3251 = vmatmul.mubr.bf16.gmra.mrb[100].mxu0 %v2704_v38 }
 0x22b   : > { %v4404_v54 = vadd.f32 %v2032_v9, %v1647_v50  ;;  %v2034_v60 = vpop.f32.mrb[42].mxu0  ;;  %v1679_v50 = vadd.f32 %v6284_v2, %v6437_v44  ;;  %v1687_v2 = vadd.f32 %v6303_v31, %v6442_v55  ;;  %v5199_v31 = vld [vmem:[%s6957_s5 + $0x48] sm:$0xff]  }
 0x22c   : > { %v4406_v52 = vadd.f32 %v2034_v60, %v1649_v28  ;;  %v2036_v4 = vpop.f32.mrb[43].mxu0  ;;  %4211 = vmatprep.subr.bf16.mxu1 %v5199_v31 }
 0x22d   : > { %v4408_v36 = vadd.f32 %v2036_v4, %v1651_v20  ;;  %v1685_v4 = vadd.f32 %v6301_v22, %v6437_v44 }
 0x22e   : > { %v2708_v53 = vpack.c.bf16 %v4406_v52, %v4402_v1  ;;  %v1681_v1 = vadd.f32 %v6286_v13, %v6442_v55 }
 0x22f   : > { %v2709_v17 = vpack.c.bf16 %v4408_v36, %v4404_v54 }
 0x231   : > { %v2040_v21 = vpop.f32.mrb[44].mxu0  ;;  %3260 = vmatprep.mubr.bf16.mxu0 %v2709_v17 }
 0x232   : > { %v4410_v16 = vadd.f32 %v2040_v21, %v1655_v24  ;;  %v2042_v47 = vpop.f32.mrb[45].mxu0  ;;  %3261 = vmatmul.mubr.bf16.gmra.mrb[104].mxu0 %v2708_v53  ;;  %v1689_v53 = vadd.f32 %v6307_v59, %v6437_v44  ;;  %v1691_v24 = vadd.f32 %v6309_v6, %v6442_v55  ;;  %v5200_v59 = vld [vmem:[%s6957_s5 + $0x8] sm:$0xff]   ;;  %v1697_v6 = vadd.f32 %v6326_v39, %v6442_v55 }
 0x233   : > { %v4412_v45 = vadd.f32 %v2042_v47, %v1657_v48  ;;  %v2044_v12 = vpop.f32.mrb[46].mxu0  ;;  %4212 = vmatpush3.bf16.msra.mxu1 %v5200_v59 }
 0x234   : > { %v4414_v51 = vadd.f32 %v2044_v12, %v1659_v11  ;;  %v2046_v62 = vpop.f32.mrb[47].mxu0 }
 0x235   : > { %v4416_v29 = vadd.f32 %v2046_v62, %v1661_v49 }
 0x236   : > { %v2712_v5 = vpack.c.bf16 %v4414_v51, %v4410_v16  ;;  %v1699_v51 = vadd.f32 %v6330_v37, %v6437_v44 }
 0x237   : > { %v2713_v61 = vpack.c.bf16 %v4416_v29, %v4412_v45  ;;  %v1695_v45 = vadd.f32 %v6324_v63, %v6437_v44 }
 0x239   : > { %v2050_v34 = vpop.f32.mrb[48].mxu0  ;;  %3270 = vmatprep.mubr.bf16.mxu0 %v2713_v61 }
 0x23a   : > { %v4418_v14 = vadd.f32 %v2050_v34, %v1665_v41  ;;  %v2052_v7 = vpop.f32.mrb[49].mxu0  ;;  %3271 = vmatmul.mubr.bf16.gmra.mrb[108].mxu0 %v2712_v5  ;;  %v1701_v5 = vadd.f32 %v6332_v8, %v6442_v55  ;;  %v688_v34 = vsub.s32 2, %v6422_v56  ;;  %v5201_v55 = vld [vmem:[%s6957_s5 + $0x50] sm:$0xff]  }
 0x23b   : > { %v4420_v3 = vadd.f32 %v2052_v7, %v1667_v35  ;;  %v2054_v40 = vpop.f32.mrb[50].mxu0  ;;  %4213 = vmatprep.subr.bf16.mxu1 %v5201_v55 }
 0x23c   : > { %v4422_v19 = vadd.f32 %v2054_v40, %v1669_v23  ;;  %v2056_v27 = vpop.f32.mrb[51].mxu0  ;;  %v692_v23 = vsub.s32 3, %v6422_v56  ;;  %v6662_v37 = vrot.slane %v6430_v26, %v688_v34  ;;  %v5203_v40 = vld [vmem:[%s6957_s5 + $0x58] sm:$0xff]  }
 0x23d   : > { %v4424_v15 = vadd.f32 %v2056_v27, %v1671_v43 }
 0x23e   : > { %v2716_v42 = vpack.c.bf16 %v4422_v19, %v4418_v14  ;;  %v6665_v43 = vrot.slane %v6430_v26, %v692_v23 }
 0x23f   : > { %v2717_v38 = vpack.c.bf16 %v4424_v15, %v4420_v3  ;;  %v5202_v3 = vld [vmem:[%s6957_s5 + $0x10] sm:$0xff]  }
 0x240   : > { %4214 = vmatpush3.bf16.msra.mxu1 %v5202_v3 }
 0x241   : > { %v2060_v46 = vpop.f32.mrb[52].mxu0  ;;  %3280 = vmatprep.mubr.bf16.mxu0 %v2717_v38  ;;  %4215 = vmatprep.subr.bf16.mxu1 %v5203_v40 }
 0x242   : > { %v4426_v57 = vadd.f32 %v2060_v46, %v1675_v18  ;;  %v2062_v28 = vpop.f32.mrb[53].mxu0  ;;  %3281 = vmatmul.mubr.bf16.gmra.mrb[112].mxu0 %v2716_v42  ;;  %v5205_v18 = vld [vmem:[%s6957_s5 + $0x60] sm:$0xff]  }
 0x243   : > { %v4428_v9 = vadd.f32 %v2062_v28, %v1677_v32  ;;  %v2064_v20 = vpop.f32.mrb[54].mxu0  ;;  %v5207_v28 = vld [vmem:[%s6957_s5 + $0x68] sm:$0xff]  }
 0x244   : > { %v4430_v54 = vadd.f32 %v2064_v20, %v1679_v50  ;;  %v2066_v0 = vpop.f32.mrb[55].mxu0  ;;  %4216 = vmatpush3.bf16.msra.mxu1 %v5204_v33  ;;  %v5206_v50 = vld [vmem:[%s6957_s5 + $0x20] sm:$0xff]  }
 0x245   : > { %v4432_v60 = vadd.f32 %v2066_v0, %v1681_v1  ;;  %4217 = vmatprep.subr.bf16.mxu1 %v5205_v18 }
 0x246   : > { %v2720_v52 = vpack.c.bf16 %v4430_v54, %v4426_v57 }
 0x247   : > { %v2721_v10 = vpack.c.bf16 %v4432_v60, %v4428_v9 }
 0x248   : > { %4218 = vmatpush3.bf16.msra.mxu1 %v5206_v50 }
 0x249   : > { %v2070_v36 = vpop.f32.mrb[56].mxu0  ;;  %3290 = vmatprep.mubr.bf16.mxu0 %v2721_v10  ;;  %4219 = vmatprep.subr.bf16.mxu1 %v5207_v28 }
 0x24a   : > { %v4434_v17 = vadd.f32 %v2070_v36, %v1685_v4  ;;  %v2072_v13 = vpop.f32.mrb[57].mxu0  ;;  %3291 = vmatmul.mubr.bf16.gmra.mrb[116].mxu0 %v2720_v52  ;;  %v5208_v52 = vld [vmem:[%s6957_s5 + $0x28] sm:$0xff]   ;;  %v5209_v4 = vld [vmem:[%s6957_s5 + $0x70] sm:$0xff]  }
 0x24b   : > { %v4436_v48 = vadd.f32 %v2072_v13, %v1687_v2  ;;  %v2074_v21 = vpop.f32.mrb[58].mxu0  ;;  %v5211_v13 = vld [vmem:[%s6957_s5 + $0x78] sm:$0xff]  }
 0x24c   : > { %v4438_v11 = vadd.f32 %v2074_v21, %v1689_v53  ;;  %v2076_v16 = vpop.f32.mrb[59].mxu0  ;;  %4220 = vmatpush3.bf16.msra.mxu1 %v5208_v52  ;;  %v5210_v53 = vld [vmem:[%s6957_s5 + $0x30] sm:$0xff]  }
 0x24d   : > { %v4440_v47 = vadd.f32 %v2076_v16, %v1691_v24  ;;  %4221 = vmatprep.subr.bf16.mxu1 %v5209_v4 }
 0x24e   : > { %v2724_v22 = vpack.c.bf16 %v4438_v11, %v4434_v17 }
 0x24f   : > { %v2725_v49 = vpack.c.bf16 %v4440_v47, %v4436_v48 }
 0x250   : > { %4222 = vmatpush3.bf16.msra.mxu1 %v5210_v53 }
 0x251   : > { %v2080_v12 = vpop.f32.mrb[60].mxu0  ;;  %3300 = vmatprep.mubr.bf16.mxu0 %v2725_v49  ;;  %4223 = vmatprep.subr.bf16.mxu1 %v5211_v13 }
 0x252   : > { %v4442_v62 = vadd.f32 %v2080_v12, %v1695_v45  ;;  %v2082_v29 = vpop.f32.mrb[61].mxu0  ;;  %3301 = vmatmul.mubr.bf16.gmra.mrb[120].mxu0 %v2724_v22  ;;  %v5212_v22 = vld [vmem:[%s6957_s5 + $0x38] sm:$0xff]  }
 0x253   : > { %v4444_v61 = vadd.f32 %v2082_v29, %v1697_v6  ;;  %v2084_v41 = vpop.f32.mrb[62].mxu0 }
 0x254   : > { %v4446_v35 = vadd.f32 %v2084_v41, %v1699_v51  ;;  %v2086_v63 = vpop.f32.mrb[63].mxu0  ;;  %4224 = vmatpush3.bf16.msra.mxu1 %v5212_v22 }
 0x255   : > { %v4448_v39 = vadd.f32 %v2086_v63, %v1701_v5 }
 0x256   : > { %v2728_v14 = vpack.c.bf16 %v4446_v35, %v4442_v62 }
 0x257   : > { %v2729_v7 = vpack.c.bf16 %v4448_v39, %v4444_v61 }
 0x259   : > { %v2509_v44 = vpop.f32.mrb[32].mxu1  ;;  %3310 = vmatprep.mubr.bf16.mxu0 %v2729_v7 }
 0x25a   : > { %v2511_v8 = vpop.f32.mrb[33].mxu1  ;;  %3311 = vmatmul.mubr.bf16.gmra.mrb[124].mxu0 %v2728_v14  ;;  %v4449_v27 = vadd.f32 %v2509_v44, %v6662_v37 }
 0x25b   : > { %v2513_v19 = vpop.f32.mrb[34].mxu1  ;;  %v4450_v42 = vadd.f32 %v2511_v8, %v6665_v43 }
 0x25c   : > { %v4451_v26 = vadd.f32 %v2513_v19, %v6662_v37  ;;  %v2515_v15 = vpop.f32.mrb[35].mxu1 }
 0x25d   : > { %v4452_v38 = vadd.f32 %v2515_v15, %v6665_v43 }
 0x25e   : > { %v2670_v30 = vpack.c.bf16 %v4451_v26, %v4449_v27 }
 0x25f   : > { %v2671_v32 = vpack.c.bf16 %v4452_v38, %v4450_v42 }
 0x261   : > { %v2519_v46 = vpop.f32.mrb[36].mxu1  ;;  %3353 = vmatprep.mubr.bf16.mxu0 %v2671_v32 }
 0x262   : > { %v2521_v57 = vpop.f32.mrb[37].mxu1  ;;  %3354 = vmatmul.mubr.bf16.vlgmr.msra.gmra.mrb[64].mxu0 %v2670_v30  ;;  %v4453_v9 = vadd.f32 %v2519_v46, %v6662_v37 }
 0x263   : > { %v2523_v1 = vpop.f32.mrb[38].mxu1  ;;  %v4454_v0 = vadd.f32 %v2521_v57, %v6665_v43 }
 0x264   : > { %v4455_v20 = vadd.f32 %v2523_v1, %v6662_v37  ;;  %v2525_v54 = vpop.f32.mrb[39].mxu1 }
 0x265   : > { %v4456_v60 = vadd.f32 %v2525_v54, %v6665_v43 }
 0x266   : > { %v2674_v10 = vpack.c.bf16 %v4455_v20, %v4453_v9 }
 0x267   : > { %v2675_v2 = vpack.c.bf16 %v4456_v60, %v4454_v0 }
 0x269   : > { %v2529_v36 = vpop.f32.mrb[40].mxu1  ;;  %3363 = vmatprep.mubr.bf16.mxu0 %v2675_v2 }
 0x26a   : > { %v2531_v17 = vpop.f32.mrb[41].mxu1  ;;  %3364 = vmatmul.mubr.bf16.gmra.mrb[68].mxu0 %v2674_v10  ;;  %v4457_v48 = vadd.f32 %v2529_v36, %v6662_v37 }
 0x26b   : > { %v2533_v24 = vpop.f32.mrb[42].mxu1  ;;  %v4458_v16 = vadd.f32 %v2531_v17, %v6665_v43 }
 0x26c   : > { %v4459_v21 = vadd.f32 %v2533_v24, %v6662_v37  ;;  %v2535_v11 = vpop.f32.mrb[43].mxu1 }
 0x26d   : > { %v4460_v47 = vadd.f32 %v2535_v11, %v6665_v43 }
 0x26e   : > { %v2678_v49 = vpack.c.bf16 %v4459_v21, %v4457_v48 }
 0x26f   : > { %v2679_v31 = vpack.c.bf16 %v4460_v47, %v4458_v16 }
 0x271   : > { %v2539_v59 = vpop.f32.mrb[44].mxu1  ;;  %3373 = vmatprep.mubr.bf16.mxu0 %v2679_v31 }
 0x272   : > { %v2541_v45 = vpop.f32.mrb[45].mxu1  ;;  %3374 = vmatmul.mubr.bf16.gmra.mrb[72].mxu0 %v2678_v49  ;;  %v4461_v12 = vadd.f32 %v2539_v59, %v6662_v37 }
 0x273   : > { %v2543_v6 = vpop.f32.mrb[46].mxu1  ;;  %v4462_v29 = vadd.f32 %v2541_v45, %v6665_v43 }
 0x274   : > { %v4463_v51 = vadd.f32 %v2543_v6, %v6662_v37  ;;  %v2545_v62 = vpop.f32.mrb[47].mxu1 }
 0x275   : > { %v4464_v5 = vadd.f32 %v2545_v62, %v6665_v43 }
 0x276   : > { %v2682_v61 = vpack.c.bf16 %v4463_v51, %v4461_v12 }
 0x277   : > { %v2683_v41 = vpack.c.bf16 %v4464_v5, %v4462_v29 }
 0x279   : > { %v2549_v35 = vpop.f32.mrb[48].mxu1  ;;  %3383 = vmatprep.mubr.bf16.mxu0 %v2683_v41 }
 0x27a   : > { %v2551_v63 = vpop.f32.mrb[49].mxu1  ;;  %3384 = vmatmul.mubr.bf16.gmra.mrb[76].mxu0 %v2682_v61  ;;  %v4465_v39 = vadd.f32 %v2549_v35, %v6662_v37 }
 0x27b   : > { %v2553_v34 = vpop.f32.mrb[50].mxu1  ;;  %v4466_v7 = vadd.f32 %v2551_v63, %v6665_v43 }
 0x27c   : > { %v4467_v23 = vadd.f32 %v2553_v34, %v6662_v37  ;;  %v2555_v14 = vpop.f32.mrb[51].mxu1 }
 0x27d   : > { %v4468_v44 = vadd.f32 %v2555_v14, %v6665_v43 }
 0x27e   : > { %v2686_v8 = vpack.c.bf16 %v4467_v23, %v4465_v39 }
 0x27f   : > { %v2687_v55 = vpack.c.bf16 %v4468_v44, %v4466_v7 }
 0x281   : > { %v2559_v3 = vpop.f32.mrb[52].mxu1  ;;  %3393 = vmatprep.mubr.bf16.mxu0 %v2687_v55 }
 0x282   : > { %v2561_v40 = vpop.f32.mrb[53].mxu1  ;;  %3394 = vmatmul.mubr.bf16.gmra.mrb[80].mxu0 %v2686_v8  ;;  %v4469_v27 = vadd.f32 %v2559_v3, %v6662_v37 }
 0x283   : > { %v2563_v19 = vpop.f32.mrb[54].mxu1  ;;  %v4470_v42 = vadd.f32 %v2561_v40, %v6665_v43 }
 0x284   : > { %v4471_v26 = vadd.f32 %v2563_v19, %v6662_v37  ;;  %v2565_v15 = vpop.f32.mrb[55].mxu1 }
 0x285   : > { %v4472_v38 = vadd.f32 %v2565_v15, %v6665_v43 }
 0x286   : > { %v2690_v33 = vpack.c.bf16 %v4471_v26, %v4469_v27 }
 0x287   : > { %v2691_v30 = vpack.c.bf16 %v4472_v38, %v4470_v42 }
 0x289   : > { %v2569_v18 = vpop.f32.mrb[56].mxu1  ;;  %3403 = vmatprep.mubr.bf16.mxu0 %v2691_v30 }
 0x28a   : > { %v2571_v32 = vpop.f32.mrb[57].mxu1  ;;  %3404 = vmatmul.mubr.bf16.gmra.mrb[84].mxu0 %v2690_v33  ;;  %v4473_v50 = vadd.f32 %v2569_v18, %v6662_v37 }
 0x28b   : > { %v2573_v46 = vpop.f32.mrb[58].mxu1  ;;  %v4474_v1 = vadd.f32 %v2571_v32, %v6665_v43 }
 0x28c   : > { %v4475_v57 = vadd.f32 %v2573_v46, %v6662_v37  ;;  %v2575_v28 = vpop.f32.mrb[59].mxu1 }
 0x28d   : > { %v4476_v9 = vadd.f32 %v2575_v28, %v6665_v43 }
 0x28e   : > { %v2694_v20 = vpack.c.bf16 %v4475_v57, %v4473_v50 }
 0x28f   : > { %v2695_v54 = vpack.c.bf16 %v4476_v9, %v4474_v1 }
 0x291   : > { %v2579_v0 = vpop.f32.mrb[60].mxu1  ;;  %3413 = vmatprep.mubr.bf16.mxu0 %v2695_v54 }
 0x292   : > { %v2581_v60 = vpop.f32.mrb[61].mxu1  ;;  %3414 = vmatmul.mubr.bf16.gmra.mrb[88].mxu0 %v2694_v20  ;;  %v4477_v10 = vadd.f32 %v2579_v0, %v6662_v37 }
 0x293   : > { %v2583_v52 = vpop.f32.mrb[62].mxu1  ;;  %v4478_v36 = vadd.f32 %v2581_v60, %v6665_v43 }
 0x294   : > { %v4479_v4 = vadd.f32 %v2583_v52, %v6662_v37  ;;  %v2585_v2 = vpop.f32.mrb[63].mxu1 }
 0x295   : > { %v4480_v53 = vadd.f32 %v2585_v2, %v6665_v43 }
 0x296   : > { %v2698_v17 = vpack.c.bf16 %v4479_v4, %v4477_v10 }
 0x297   : > { %v2699_v13 = vpack.c.bf16 %v4480_v53, %v4478_v36 }
 0x299   : > { %v2589_v24 = vpop.f32.mrb[64].mxu1  ;;  %3423 = vmatprep.mubr.bf16.mxu0 %v2699_v13 }
 0x29a   : > { %v2591_v48 = vpop.f32.mrb[65].mxu1  ;;  %3424 = vmatmul.mubr.bf16.gmra.mrb[92].mxu0 %v2698_v17  ;;  %v4481_v11 = vadd.f32 %v2589_v24, %v6662_v37 }
 0x29b   : > { %v2593_v21 = vpop.f32.mrb[66].mxu1  ;;  %v4482_v22 = vadd.f32 %v2591_v48, %v6665_v43 }
 0x29c   : > { %v4483_v16 = vadd.f32 %v2593_v21, %v6662_v37  ;;  %v2595_v47 = vpop.f32.mrb[67].mxu1 }
 0x29d   : > { %v4484_v49 = vadd.f32 %v2595_v47, %v6665_v43 }
 0x29e   : > { %v2702_v31 = vpack.c.bf16 %v4483_v16, %v4481_v11 }
 0x29f   : > { %v2703_v59 = vpack.c.bf16 %v4484_v49, %v4482_v22 }
 0x2a1   : > { %v2599_v45 = vpop.f32.mrb[68].mxu1  ;;  %3433 = vmatprep.mubr.bf16.mxu0 %v2703_v59 }
 0x2a2   : > { %v2601_v6 = vpop.f32.mrb[69].mxu1  ;;  %3434 = vmatmul.mubr.bf16.gmra.mrb[96].mxu0 %v2702_v31  ;;  %v4485_v51 = vadd.f32 %v2599_v45, %v6662_v37 }
 0x2a3   : > { %v2603_v12 = vpop.f32.mrb[70].mxu1  ;;  %v4486_v5 = vadd.f32 %v2601_v6, %v6665_v43 }
 0x2a4   : > { %v4487_v62 = vadd.f32 %v2603_v12, %v6662_v37  ;;  %v2605_v29 = vpop.f32.mrb[71].mxu1 }
 0x2a5   : > { %v4488_v61 = vadd.f32 %v2605_v29, %v6665_v43 }
 0x2a6   : > { %v2706_v41 = vpack.c.bf16 %v4487_v62, %v4485_v51 }
 0x2a7   : > { %v2707_v35 = vpack.c.bf16 %v4488_v61, %v4486_v5 }
 0x2a9   : > { %v2609_v63 = vpop.f32.mrb[72].mxu1  ;;  %3443 = vmatprep.mubr.bf16.mxu0 %v2707_v35 }
 0x2aa   : > { %v2611_v34 = vpop.f32.mrb[73].mxu1  ;;  %3444 = vmatmul.mubr.bf16.gmra.mrb[100].mxu0 %v2706_v41  ;;  %v4489_v23 = vadd.f32 %v2609_v63, %v6662_v37 }
 0x2ab   : > { %v2613_v39 = vpop.f32.mrb[74].mxu1  ;;  %v4490_v44 = vadd.f32 %v2611_v34, %v6665_v43  ;;  %v2796_v34 = vld [vmem:[%s6956_s4] sm:$0x3] }
 0x2ac   : > { %v4491_v14 = vadd.f32 %v2613_v39, %v6662_v37  ;;  %v2615_v7 = vpop.f32.mrb[75].mxu1  ;;  %v6772_v39 = vrot.slane %v2796_v34, %v680_v25 }
 0x2ad   : > { %v4492_v8 = vadd.f32 %v2615_v7, %v6665_v43 }
 0x2ae   : > { %v2710_v55 = vpack.c.bf16 %v4491_v14, %v4489_v23 }
 0x2af   : > { %v2711_v3 = vpack.c.bf16 %v4492_v8, %v4490_v44 }
 0x2b1   : > { %v2619_v40 = vpop.f32.mrb[76].mxu1  ;;  %3453 = vmatprep.mubr.bf16.mxu0 %v2711_v3 }
 0x2b2   : > { %v2621_v19 = vpop.f32.mrb[77].mxu1  ;;  %3454 = vmatmul.mubr.bf16.gmra.mrb[104].mxu0 %v2710_v55  ;;  %v4493_v26 = vadd.f32 %v2619_v40, %v6662_v37 }
 0x2b3   : > { %v2623_v27 = vpop.f32.mrb[78].mxu1  ;;  %v4494_v38 = vadd.f32 %v2621_v19, %v6665_v43 }
 0x2b4   : > { %v4495_v15 = vadd.f32 %v2623_v27, %v6662_v37  ;;  %v2625_v42 = vpop.f32.mrb[79].mxu1 }
 0x2b5   : > { %v4496_v33 = vadd.f32 %v2625_v42, %v6665_v43 }
 0x2b6   : > { %v2714_v30 = vpack.c.bf16 %v4495_v15, %v4493_v26 }
 0x2b7   : > { %v2715_v18 = vpack.c.bf16 %v4496_v33, %v4494_v38 }
 0x2b9   : > { %v2629_v32 = vpop.f32.mrb[80].mxu1  ;;  %3463 = vmatprep.mubr.bf16.mxu0 %v2715_v18 }
 0x2ba   : > { %v2631_v46 = vpop.f32.mrb[81].mxu1  ;;  %3464 = vmatmul.mubr.bf16.gmra.mrb[108].mxu0 %v2714_v30  ;;  %v4497_v57 = vadd.f32 %v2629_v32, %v6662_v37 }
 0x2bb   : > { %v2633_v50 = vpop.f32.mrb[82].mxu1  ;;  %v4498_v9 = vadd.f32 %v2631_v46, %v6665_v43 }
 0x2bc   : > { %v4499_v28 = vadd.f32 %v2633_v50, %v6662_v37  ;;  %v2635_v1 = vpop.f32.mrb[83].mxu1 }
 0x2bd   : > { %v4500_v20 = vadd.f32 %v2635_v1, %v6665_v43 }
 0x2be   : > { %v2718_v54 = vpack.c.bf16 %v4499_v28, %v4497_v57 }
 0x2bf   : > { %v2719_v0 = vpack.c.bf16 %v4500_v20, %v4498_v9 }
 0x2c1   : > { %v2639_v60 = vpop.f32.mrb[84].mxu1  ;;  %3473 = vmatprep.mubr.bf16.mxu0 %v2719_v0 }
 0x2c2   : > { %v2641_v52 = vpop.f32.mrb[85].mxu1  ;;  %3474 = vmatmul.mubr.bf16.gmra.mrb[112].mxu0 %v2718_v54  ;;  %v4501_v4 = vadd.f32 %v2639_v60, %v6662_v37 }
 0x2c3   : > { %v2643_v10 = vpop.f32.mrb[86].mxu1  ;;  %v4502_v53 = vadd.f32 %v2641_v52, %v6665_v43 }
 0x2c4   : > { %v4503_v2 = vadd.f32 %v2643_v10, %v6662_v37  ;;  %v2645_v36 = vpop.f32.mrb[87].mxu1 }
 0x2c5   : > { %v4504_v17 = vadd.f32 %v2645_v36, %v6665_v43 }
 0x2c6   : > { %v2722_v13 = vpack.c.bf16 %v4503_v2, %v4501_v4 }
 0x2c7   : > { %v2723_v24 = vpack.c.bf16 %v4504_v17, %v4502_v53 }
 0x2c9   : > { %v2649_v48 = vpop.f32.mrb[88].mxu1  ;;  %3483 = vmatprep.mubr.bf16.mxu0 %v2723_v24 }
 0x2ca   : > { %v2651_v21 = vpop.f32.mrb[89].mxu1  ;;  %3484 = vmatmul.mubr.bf16.gmra.mrb[116].mxu0 %v2722_v13  ;;  %v4505_v16 = vadd.f32 %v2649_v48, %v6662_v37 }
 0x2cb   : > { %v2653_v11 = vpop.f32.mrb[90].mxu1  ;;  %v4506_v49 = vadd.f32 %v2651_v21, %v6665_v43 }
 0x2cc   : > { %v4507_v47 = vadd.f32 %v2653_v11, %v6662_v37  ;;  %v2655_v22 = vpop.f32.mrb[91].mxu1 }
 0x2cd   : > { %v4508_v31 = vadd.f32 %v2655_v22, %v6665_v43 }
 0x2ce   : > { %v2726_v59 = vpack.c.bf16 %v4507_v47, %v4505_v16 }
 0x2cf   : > { %v2727_v45 = vpack.c.bf16 %v4508_v31, %v4506_v49 }
 0x2d1   : > { %v2659_v6 = vpop.f32.mrb[92].mxu1  ;;  %3493 = vmatprep.mubr.bf16.mxu0 %v2727_v45 }
 0x2d2   : > { %v2661_v12 = vpop.f32.mrb[93].mxu1  ;;  %3494 = vmatmul.mubr.bf16.gmra.mrb[120].mxu0 %v2726_v59  ;;  %v4509_v62 = vadd.f32 %v2659_v6, %v6662_v37 }
 0x2d3   : > { %v2663_v51 = vpop.f32.mrb[94].mxu1  ;;  %v4510_v61 = vadd.f32 %v2661_v12, %v6665_v43 }
 0x2d4   : > { %v4511_v29 = vadd.f32 %v2663_v51, %v6662_v37  ;;  %v2665_v5 = vpop.f32.mrb[95].mxu1  ;;  %v6776_v37 = vrot.slane %v2796_v34, %v684_v58 }
 0x2d5   : > { %v4512_v41 = vadd.f32 %v2665_v5, %v6665_v43 }
 0x2d6   : > { %v2730_v35 = vpack.c.bf16 %v4511_v29, %v4509_v62 }
 0x2d7   : > { %v2731_v63 = vpack.c.bf16 %v4512_v41, %v4510_v61 }
 0x2d9   : > { %3503 = vmatprep.mubr.bf16.mxu0 %v2731_v63 }
 0x2da   : > { %3504 = vmatmul.mubr.bf16.gmra.mrb[124].mxu0 %v2730_v35 }
 0x335   : > { %v3355_v23 = vpop.f32.mrb[64].mxu0 }
 0x336   : > { %v3357_v14 = vpop.f32.mrb[65].mxu0  ;;  %v4513_v43 = vadd.f32 %v3355_v23, %v6772_v39 }
 0x337   : > { %v3359_v7 = vpop.f32.mrb[66].mxu0  ;;  %v4514_v55 = vadd.f32 %v3357_v14, %v6776_v37 }
 0x338   : > { %v4515_v44 = vadd.f32 %v3359_v7, %v6772_v39  ;;  %v3361_v8 = vpop.f32.mrb[67].mxu0 }
 0x339   : > { %v4516_v3 = vadd.f32 %v3361_v8, %v6776_v37 }
 0x33a   : > { %v3514_v40 = vpack.c.bf16 %v4515_v44, %v4513_v43 }
 0x33b   : > { %v3515_v19 = vpack.c.bf16 %v4516_v3, %v4514_v55 }
 0x33d   : > { %v3365_v25 = vpop.f32.mrb[68].mxu0  ;;  %3713 = vmatprep.mubr.bf16.mxu1 %v3515_v19 }
 0x33e   : > { %v3367_v27 = vpop.f32.mrb[69].mxu0  ;;  %3714 = vmatmul.mubr.bf16.vlgmr.msra.gmra.mrb[96].mxu1 %v3514_v40  ;;  %v4517_v58 = vadd.f32 %v3365_v25, %v6772_v39 }
 0x33f   : > { %v3369_v56 = vpop.f32.mrb[70].mxu0  ;;  %v4518_v42 = vadd.f32 %v3367_v27, %v6776_v37 }
 0x340   : > { %v4519_v26 = vadd.f32 %v3369_v56, %v6772_v39  ;;  %v3371_v15 = vpop.f32.mrb[71].mxu0 }
 0x341   : > { %v4520_v38 = vadd.f32 %v3371_v15, %v6776_v37 }
 0x342   : > { %v3516_v33 = vpack.c.bf16 %v4519_v26, %v4517_v58 }
 0x343   : > { %v3517_v30 = vpack.c.bf16 %v4520_v38, %v4518_v42 }
 0x345   : > { %v3375_v18 = vpop.f32.mrb[72].mxu0  ;;  %3721 = vmatprep.mubr.bf16.mxu1 %v3517_v30 }
 0x346   : > { %v3377_v32 = vpop.f32.mrb[73].mxu0  ;;  %3722 = vmatmul.mubr.bf16.gmra.mrb[100].mxu1 %v3516_v33  ;;  %v4521_v50 = vadd.f32 %v3375_v18, %v6772_v39 }
 0x347   : > { %v3379_v46 = vpop.f32.mrb[74].mxu0  ;;  %v4522_v1 = vadd.f32 %v3377_v32, %v6776_v37 }
 0x348   : > { %v4523_v57 = vadd.f32 %v3379_v46, %v6772_v39  ;;  %v3381_v28 = vpop.f32.mrb[75].mxu0 }
 0x349   : > { %v4524_v9 = vadd.f32 %v3381_v28, %v6776_v37 }
 0x34a   : > { %v3518_v20 = vpack.c.bf16 %v4523_v57, %v4521_v50 }
 0x34b   : > { %v3519_v54 = vpack.c.bf16 %v4524_v9, %v4522_v1 }
 0x34d   : > { %v3385_v0 = vpop.f32.mrb[76].mxu0  ;;  %3729 = vmatprep.mubr.bf16.mxu1 %v3519_v54 }
 0x34e   : > { %v3387_v60 = vpop.f32.mrb[77].mxu0  ;;  %3730 = vmatmul.mubr.bf16.gmra.mrb[104].mxu1 %v3518_v20  ;;  %v4525_v10 = vadd.f32 %v3385_v0, %v6772_v39 }
 0x34f   : > { %v3389_v52 = vpop.f32.mrb[78].mxu0  ;;  %v4526_v36 = vadd.f32 %v3387_v60, %v6776_v37 }
 0x350   : > { %v4527_v4 = vadd.f32 %v3389_v52, %v6772_v39  ;;  %v3391_v2 = vpop.f32.mrb[79].mxu0 }
 0x351   : > { %v4528_v53 = vadd.f32 %v3391_v2, %v6776_v37 }
 0x352   : > { %v3520_v17 = vpack.c.bf16 %v4527_v4, %v4525_v10 }
 0x353   : > { %v3521_v13 = vpack.c.bf16 %v4528_v53, %v4526_v36 }
 0x355   : > { %v3395_v24 = vpop.f32.mrb[80].mxu0  ;;  %3737 = vmatprep.mubr.bf16.mxu1 %v3521_v13 }
 0x356   : > { %v3397_v48 = vpop.f32.mrb[81].mxu0  ;;  %3738 = vmatmul.mubr.bf16.gmra.mrb[108].mxu1 %v3520_v17  ;;  %v4529_v11 = vadd.f32 %v3395_v24, %v6772_v39 }
 0x357   : > { %v3399_v21 = vpop.f32.mrb[82].mxu0  ;;  %v4530_v22 = vadd.f32 %v3397_v48, %v6776_v37 }
 0x358   : > { %v4531_v16 = vadd.f32 %v3399_v21, %v6772_v39  ;;  %v3401_v47 = vpop.f32.mrb[83].mxu0 }
 0x359   : > { %v4532_v49 = vadd.f32 %v3401_v47, %v6776_v37 }
 0x35a   : > { %v3522_v31 = vpack.c.bf16 %v4531_v16, %v4529_v11 }
 0x35b   : > { %v3523_v59 = vpack.c.bf16 %v4532_v49, %v4530_v22 }
 0x35d   : > { %v3405_v45 = vpop.f32.mrb[84].mxu0  ;;  %3745 = vmatprep.mubr.bf16.mxu1 %v3523_v59 }
 0x35e   : > { %v3407_v6 = vpop.f32.mrb[85].mxu0  ;;  %3746 = vmatmul.mubr.bf16.gmra.mrb[112].mxu1 %v3522_v31  ;;  %v4533_v51 = vadd.f32 %v3405_v45, %v6772_v39 }
 0x35f   : > { %v3409_v12 = vpop.f32.mrb[86].mxu0  ;;  %v4534_v5 = vadd.f32 %v3407_v6, %v6776_v37 }
 0x360   : > { %v4535_v62 = vadd.f32 %v3409_v12, %v6772_v39  ;;  %v3411_v29 = vpop.f32.mrb[87].mxu0 }
 0x361   : > { %v4536_v61 = vadd.f32 %v3411_v29, %v6776_v37 }
 0x362   : > { %v3524_v41 = vpack.c.bf16 %v4535_v62, %v4533_v51 }
 0x363   : > { %v3525_v35 = vpack.c.bf16 %v4536_v61, %v4534_v5 }
 0x365   : > { %v3415_v63 = vpop.f32.mrb[88].mxu0  ;;  %3753 = vmatprep.mubr.bf16.mxu1 %v3525_v35 }
 0x366   : > { %v3417_v34 = vpop.f32.mrb[89].mxu0  ;;  %3754 = vmatmul.mubr.bf16.gmra.mrb[116].mxu1 %v3524_v41  ;;  %v4537_v14 = vadd.f32 %v3415_v63, %v6772_v39 }
 0x367   : > { %v3419_v23 = vpop.f32.mrb[90].mxu0  ;;  %v4538_v44 = vadd.f32 %v3417_v34, %v6776_v37 }
 0x368   : > { %v4539_v7 = vadd.f32 %v3419_v23, %v6772_v39  ;;  %v3421_v43 = vpop.f32.mrb[91].mxu0 }
 0x369   : > { %v4540_v8 = vadd.f32 %v3421_v43, %v6776_v37 }
 0x36a   : > { %v3526_v55 = vpack.c.bf16 %v4539_v7, %v4537_v14 }
 0x36b   : > { %v3527_v3 = vpack.c.bf16 %v4540_v8, %v4538_v44 }
 0x36d   : > { %v3425_v40 = vpop.f32.mrb[92].mxu0  ;;  %3761 = vmatprep.mubr.bf16.mxu1 %v3527_v3 }
 0x36e   : > { %v3427_v19 = vpop.f32.mrb[93].mxu0  ;;  %3762 = vmatmul.mubr.bf16.gmra.mrb[120].mxu1 %v3526_v55  ;;  %v4541_v27 = vadd.f32 %v3425_v40, %v6772_v39 }
 0x36f   : > { %v3429_v25 = vpop.f32.mrb[94].mxu0  ;;  %v4542_v26 = vadd.f32 %v3427_v19, %v6776_v37 }
 0x370   : > { %v4543_v56 = vadd.f32 %v3429_v25, %v6772_v39  ;;  %v3431_v58 = vpop.f32.mrb[95].mxu0 }
 0x371   : > { %v4544_v15 = vadd.f32 %v3431_v58, %v6776_v37 }
 0x372   : > { %v3528_v42 = vpack.c.bf16 %v4543_v56, %v4541_v27 }
 0x373   : > { %v3529_v38 = vpack.c.bf16 %v4544_v15, %v4542_v26 }
 0x375   : > { %v3435_v33 = vpop.f32.mrb[96].mxu0  ;;  %3769 = vmatprep.mubr.bf16.mxu1 %v3529_v38 }
 0x376   : > { %v3437_v30 = vpop.f32.mrb[97].mxu0  ;;  %3770 = vmatmul.mubr.bf16.gmra.mrb[124].mxu1 %v3528_v42  ;;  %v4545_v32 = vadd.f32 %v3435_v33, %v6772_v39 }
 0x377   : > { %v3439_v18 = vpop.f32.mrb[98].mxu0  ;;  %v4546_v57 = vadd.f32 %v3437_v30, %v6776_v37 }
 0x378   : > { %v4547_v46 = vadd.f32 %v3439_v18, %v6772_v39  ;;  %v3441_v50 = vpop.f32.mrb[99].mxu0 }
 0x379   : > { %v4548_v28 = vadd.f32 %v3441_v50, %v6776_v37 }
 0x37a   : > { %v3530_v1 = vpack.c.bf16 %v4547_v46, %v4545_v32 }
 0x37b   : > { %v3531_v9 = vpack.c.bf16 %v4548_v28, %v4546_v57 }
 0x37d   : > { %v3445_v20 = vpop.f32.mrb[100].mxu0  ;;  %3777 = vmatprep.mubr.bf16.mxu1 %v3531_v9 }
 0x37e   : > { %v3447_v54 = vpop.f32.mrb[101].mxu0  ;;  %3778 = vmatmul.mubr.bf16.gmra.mrb[128].mxu1 %v3530_v1  ;;  %v4549_v60 = vadd.f32 %v3445_v20, %v6772_v39 }
 0x37f   : > { %v3449_v0 = vpop.f32.mrb[102].mxu0  ;;  %v4550_v4 = vadd.f32 %v3447_v54, %v6776_v37 }
 0x380   : > { %v4551_v52 = vadd.f32 %v3449_v0, %v6772_v39  ;;  %v3451_v10 = vpop.f32.mrb[103].mxu0 }
 0x381   : > { %v4552_v2 = vadd.f32 %v3451_v10, %v6776_v37 }
 0x382   : > { %v3532_v36 = vpack.c.bf16 %v4551_v52, %v4549_v60 }
 0x383   : > { %v3533_v53 = vpack.c.bf16 %v4552_v2, %v4550_v4 }
 0x385   : > { %v3455_v17 = vpop.f32.mrb[104].mxu0  ;;  %3785 = vmatprep.mubr.bf16.mxu1 %v3533_v53  ;;  %v6846_v53 = vld [vmem:[%s6958_s6] ss:$0 sm:$0xff] }
 0x386   : > { %v3457_v13 = vpop.f32.mrb[105].mxu0  ;;  %3786 = vmatmul.mubr.bf16.gmra.mrb[132].mxu1 %v3532_v36  ;;  %v4553_v48 = vadd.f32 %v3455_v17, %v6772_v39 }
 0x387   : > { %v3459_v24 = vpop.f32.mrb[106].mxu0  ;;  %v4554_v16 = vadd.f32 %v3457_v13, %v6776_v37 }
 0x388   : > { %v4555_v21 = vadd.f32 %v3459_v24, %v6772_v39  ;;  %v3461_v11 = vpop.f32.mrb[107].mxu0 }
 0x389   : > { %v4556_v47 = vadd.f32 %v3461_v11, %v6776_v37 }
 0x38a   : > { %v3534_v22 = vpack.c.bf16 %v4555_v21, %v4553_v48 }
 0x38b   : > { %v3535_v49 = vpack.c.bf16 %v4556_v47, %v4554_v16 }
 0x38d   : > { %v3465_v31 = vpop.f32.mrb[108].mxu0  ;;  %3793 = vmatprep.mubr.bf16.mxu1 %v3535_v49 }
 0x38e   : > { %v3467_v59 = vpop.f32.mrb[109].mxu0  ;;  %3794 = vmatmul.mubr.bf16.gmra.mrb[136].mxu1 %v3534_v22  ;;  %v4557_v6 = vadd.f32 %v3465_v31, %v6772_v39 }
 0x38f   : > { %v3469_v45 = vpop.f32.mrb[110].mxu0  ;;  %v4558_v62 = vadd.f32 %v3467_v59, %v6776_v37 }
 0x390   : > { %v4559_v12 = vadd.f32 %v3469_v45, %v6772_v39  ;;  %v3471_v51 = vpop.f32.mrb[111].mxu0 }
 0x391   : > { %v4560_v29 = vadd.f32 %v3471_v51, %v6776_v37 }
 0x392   : > { %v3536_v5 = vpack.c.bf16 %v4559_v12, %v4557_v6 }
 0x393   : > { %v3537_v61 = vpack.c.bf16 %v4560_v29, %v4558_v62 }
 0x395   : > { %v3475_v41 = vpop.f32.mrb[112].mxu0  ;;  %3801 = vmatprep.mubr.bf16.mxu1 %v3537_v61 }
 0x396   : > { %v3477_v35 = vpop.f32.mrb[113].mxu0  ;;  %3802 = vmatmul.mubr.bf16.gmra.mrb[140].mxu1 %v3536_v5  ;;  %v4561_v34 = vadd.f32 %v3475_v41, %v6772_v39 }
 0x397   : > { %v3479_v63 = vpop.f32.mrb[114].mxu0  ;;  %v4562_v7 = vadd.f32 %v3477_v35, %v6776_v37 }
 0x398   : > { %v4563_v23 = vadd.f32 %v3479_v63, %v6772_v39  ;;  %v3481_v14 = vpop.f32.mrb[115].mxu0 }
 0x399   : > { %v4564_v43 = vadd.f32 %v3481_v14, %v6776_v37 }
 0x39a   : > { %v3538_v44 = vpack.c.bf16 %v4563_v23, %v4561_v34 }
 0x39b   : > { %v3539_v8 = vpack.c.bf16 %v4564_v43, %v4562_v7 }
 0x39d   : > { %v3485_v55 = vpop.f32.mrb[116].mxu0  ;;  %3809 = vmatprep.mubr.bf16.mxu1 %v3539_v8 }
 0x39e   : > { %v3487_v3 = vpop.f32.mrb[117].mxu0  ;;  %3810 = vmatmul.mubr.bf16.gmra.mrb[144].mxu1 %v3538_v44  ;;  %v4565_v19 = vadd.f32 %v3485_v55, %v6772_v39 }
 0x39f   : > { %v3489_v40 = vpop.f32.mrb[118].mxu0  ;;  %v4566_v56 = vadd.f32 %v3487_v3, %v6776_v37 }
 0x3a0   : > { %v4567_v25 = vadd.f32 %v3489_v40, %v6772_v39  ;;  %v3491_v27 = vpop.f32.mrb[119].mxu0 }
 0x3a1   : > { %v4568_v58 = vadd.f32 %v3491_v27, %v6776_v37 }
 0x3a2   : > { %v3540_v26 = vpack.c.bf16 %v4567_v25, %v4565_v19 }
 0x3a3   : > { %v3541_v15 = vpack.c.bf16 %v4568_v58, %v4566_v56 }
 0x3a5   : > { %v3495_v42 = vpop.f32.mrb[120].mxu0  ;;  %3817 = vmatprep.mubr.bf16.mxu1 %v3541_v15 }
 0x3a6   : > { %v3497_v38 = vpop.f32.mrb[121].mxu0  ;;  %3818 = vmatmul.mubr.bf16.gmra.mrb[148].mxu1 %v3540_v26  ;;  %v4569_v30 = vadd.f32 %v3495_v42, %v6772_v39 }
 0x3a7   : > { %v3499_v33 = vpop.f32.mrb[122].mxu0  ;;  %v4570_v46 = vadd.f32 %v3497_v38, %v6776_v37 }
 0x3a8   : > { %v4571_v18 = vadd.f32 %v3499_v33, %v6772_v39  ;;  %v3501_v32 = vpop.f32.mrb[123].mxu0 }
 0x3a9   : > { %v4572_v50 = vadd.f32 %v3501_v32, %v6776_v37 }
 0x3aa   : > { %v3542_v57 = vpack.c.bf16 %v4571_v18, %v4569_v30 }
 0x3ab   : > { %v3543_v28 = vpack.c.bf16 %v4572_v50, %v4570_v46 }
 0x3ad   : > { %v3505_v1 = vpop.f32.mrb[124].mxu0  ;;  %3825 = vmatprep.mubr.bf16.mxu1 %v3543_v28 }
 0x3ae   : > { %v3507_v9 = vpop.f32.mrb[125].mxu0  ;;  %3826 = vmatmul.mubr.bf16.gmra.mrb[152].mxu1 %v3542_v57  ;;  %v4573_v54 = vadd.f32 %v3505_v1, %v6772_v39 }
 0x3af   : > { %v3509_v20 = vpop.f32.mrb[126].mxu0  ;;  %v4574_v52 = vadd.f32 %v3507_v9, %v6776_v37 }
 0x3b0   : > { %v4575_v0 = vadd.f32 %v3509_v20, %v6772_v39  ;;  %v3511_v60 = vpop.f32.mrb[127].mxu0 }
 0x3b1   : > { %v4576_v10 = vadd.f32 %v3511_v60, %v6776_v37 }
 0x3b2   : > { %v3544_v4 = vpack.c.bf16 %v4575_v0, %v4573_v54 }
 0x3b3   : > { %v3545_v2 = vpack.c.bf16 %v4576_v10, %v4574_v52 }
 0x3b5   : > { %3833 = vmatprep.mubr.bf16.mxu1 %v3545_v2 }
 0x3b6   : > { %3834 = vmatmul.mubr.bf16.gmra.mrb[156].mxu1 %v3544_v4 }
 0x411   : > { %v4225_v36 = vpop.f32.mrb[96].mxu1 }
 0x412   : > { %v4226_v17 = vpop.f32.mrb[97].mxu1 }
 0x413   : > { %v4227_v13 = vadd.f32 %v4226_v17, %v4225_v36  ;;  %v4228_v24 = vpop.f32.mrb[98].mxu1 }
 0x414   : > { %v4229_v39 = vpop.f32.mrb[99].mxu1 }
 0x415   : > { %v3716_v37 = vadd.f32 %v4227_v13, %v6846_v53  ;;  %v4230_v48 = vadd.f32 %v4229_v39, %v4228_v24 }
 0x417   : > { %3843 = vst.msk [vmem:[%s6851_s10] sm:$0xff] %vm3842_vm2, %v3716_v37  ;;  %v3719_v21 = vadd.f32 %v4230_v48, %v6846_v53 }
 0x419   : > { %3844 = vst.msk [vmem:[%s6851_s10 + $0x8] sm:$0xff] %vm3842_vm2, %v3719_v21  ;;  %v4231_v11 = vpop.f32.mrb[100].mxu1 }
 0x41a   : > { %v4232_v16 = vpop.f32.mrb[101].mxu1 }
 0x41b   : > { %v4233_v47 = vadd.f32 %v4232_v16, %v4231_v11  ;;  %v4234_v22 = vpop.f32.mrb[102].mxu1 }
 0x41c   : > { %v4235_v49 = vpop.f32.mrb[103].mxu1 }
 0x41d   : > { %v3724_v31 = vadd.f32 %v4233_v47, %v6846_v53  ;;  %v4236_v59 = vadd.f32 %v4235_v49, %v4234_v22 }
 0x41f   : > { %3845 = vst.msk [vmem:[%s6851_s10 + $0x10] sm:$0xff] %vm3842_vm2, %v3724_v31  ;;  %v3727_v45 = vadd.f32 %v4236_v59, %v6846_v53 }
 0x421   : > { %3846 = vst.msk [vmem:[%s6851_s10 + $0x18] sm:$0xff] %vm3842_vm2, %v3727_v45  ;;  %v4237_v6 = vpop.f32.mrb[104].mxu1 }
 0x422   : > { %v4238_v12 = vpop.f32.mrb[105].mxu1 }
 0x423   : > { %v4239_v51 = vadd.f32 %v4238_v12, %v4237_v6  ;;  %v4240_v62 = vpop.f32.mrb[106].mxu1 }
 0x424   : > { %v4241_v29 = vpop.f32.mrb[107].mxu1 }
 0x425   : > { %v3732_v5 = vadd.f32 %v4239_v51, %v6846_v53  ;;  %v4242_v61 = vadd.f32 %v4241_v29, %v4240_v62 }
 0x427   : > { %3847 = vst.msk [vmem:[%s6851_s10 + $0x20] sm:$0xff] %vm3842_vm2, %v3732_v5  ;;  %v3735_v41 = vadd.f32 %v4242_v61, %v6846_v53 }
 0x429   : > { %3848 = vst.msk [vmem:[%s6851_s10 + $0x28] sm:$0xff] %vm3842_vm2, %v3735_v41  ;;  %v4243_v35 = vpop.f32.mrb[108].mxu1 }
 0x42a   : > { %v4244_v63 = vpop.f32.mrb[109].mxu1 }
 0x42b   : > { %v4245_v34 = vadd.f32 %v4244_v63, %v4243_v35  ;;  %v4246_v23 = vpop.f32.mrb[110].mxu1 }
 0x42c   : > { %v4247_v14 = vpop.f32.mrb[111].mxu1 }
 0x42d   : > { %v3740_v7 = vadd.f32 %v4245_v34, %v6846_v53  ;;  %v4248_v43 = vadd.f32 %v4247_v14, %v4246_v23 }
 0x42f   : > { %3849 = vst.msk [vmem:[%s6851_s10 + $0x30] sm:$0xff] %vm3842_vm2, %v3740_v7  ;;  %v3743_v44 = vadd.f32 %v4248_v43, %v6846_v53 }
 0x431   : > { %3850 = vst.msk [vmem:[%s6851_s10 + $0x38] sm:$0xff] %vm3842_vm2, %v3743_v44  ;;  %v4249_v8 = vpop.f32.mrb[112].mxu1 }
 0x432   : > { %v4250_v55 = vpop.f32.mrb[113].mxu1 }
 0x433   : > { %v4251_v3 = vadd.f32 %v4250_v55, %v4249_v8  ;;  %v4252_v40 = vpop.f32.mrb[114].mxu1 }
 0x434   : > { %v4253_v19 = vpop.f32.mrb[115].mxu1 }
 0x435   : > { %v3748_v25 = vadd.f32 %v4251_v3, %v6846_v53  ;;  %v4254_v27 = vadd.f32 %v4253_v19, %v4252_v40 }
 0x437   : > { %3851 = vst.msk [vmem:[%s6851_s10 + $0x40] sm:$0xff] %vm3842_vm2, %v3748_v25  ;;  %v3751_v56 = vadd.f32 %v4254_v27, %v6846_v53 }
 0x439   : > { %3852 = vst.msk [vmem:[%s6851_s10 + $0x48] sm:$0xff] %vm3842_vm2, %v3751_v56  ;;  %v4255_v58 = vpop.f32.mrb[116].mxu1 }
 0x43a   : > { %v4256_v26 = vpop.f32.mrb[117].mxu1 }
 0x43b   : > { %v4257_v15 = vadd.f32 %v4256_v26, %v4255_v58  ;;  %v4258_v42 = vpop.f32.mrb[118].mxu1 }
 0x43c   : > { %v4259_v38 = vpop.f32.mrb[119].mxu1 }
 0x43d   : > { %v3756_v33 = vadd.f32 %v4257_v15, %v6846_v53  ;;  %v4260_v30 = vadd.f32 %v4259_v38, %v4258_v42 }
 0x43f   : > { %3853 = vst.msk [vmem:[%s6851_s10 + $0x50] sm:$0xff] %vm3842_vm2, %v3756_v33  ;;  %v3759_v18 = vadd.f32 %v4260_v30, %v6846_v53 }
 0x441   : > { %3854 = vst.msk [vmem:[%s6851_s10 + $0x58] sm:$0xff] %vm3842_vm2, %v3759_v18  ;;  %v4261_v32 = vpop.f32.mrb[120].mxu1 }
 0x442   : > { %v4262_v46 = vpop.f32.mrb[121].mxu1 }
 0x443   : > { %v4263_v50 = vadd.f32 %v4262_v46, %v4261_v32  ;;  %v4264_v57 = vpop.f32.mrb[122].mxu1 }
 0x444   : > { %v4265_v28 = vpop.f32.mrb[123].mxu1 }
 0x445   : > { %v3764_v1 = vadd.f32 %v4263_v50, %v6846_v53  ;;  %v4266_v9 = vadd.f32 %v4265_v28, %v4264_v57 }
 0x447   : > { %3855 = vst.msk [vmem:[%s6851_s10 + $0x60] sm:$0xff] %vm3842_vm2, %v3764_v1  ;;  %v3767_v20 = vadd.f32 %v4266_v9, %v6846_v53 }
 0x449   : > { %3856 = vst.msk [vmem:[%s6851_s10 + $0x68] sm:$0xff] %vm3842_vm2, %v3767_v20  ;;  %v4267_v54 = vpop.f32.mrb[124].mxu1 }
 0x44a   : > { %v4268_v0 = vpop.f32.mrb[125].mxu1 }
 0x44b   : > { %v4269_v60 = vadd.f32 %v4268_v0, %v4267_v54  ;;  %v4270_v52 = vpop.f32.mrb[126].mxu1 }
 0x44c   : > { %v4271_v10 = vpop.f32.mrb[127].mxu1 }
 0x44d   : > { %v3772_v4 = vadd.f32 %v4269_v60, %v6846_v53  ;;  %v4272_v2 = vadd.f32 %v4271_v10, %v4270_v52 }
 0x44f   : > { %3857 = vst.msk [vmem:[%s6851_s10 + $0x70] sm:$0xff] %vm3842_vm2, %v3772_v4  ;;  %v3775_v36 = vadd.f32 %v4272_v2, %v6846_v53 }
 0x451   : > { %3858 = vst.msk [vmem:[%s6851_s10 + $0x78] sm:$0xff] %vm3842_vm2, %v3775_v36  ;;  %v4273_v17 = vpop.f32.mrb[128].mxu1 }
 0x452   : > { %v4274_v13 = vpop.f32.mrb[129].mxu1 }
 0x453   : > { %v4275_v24 = vadd.f32 %v4274_v13, %v4273_v17  ;;  %v4276_v39 = vpop.f32.mrb[130].mxu1 }
 0x454   : > { %v4277_v37 = vpop.f32.mrb[131].mxu1 }
 0x455   : > { %v3780_v48 = vadd.f32 %v4275_v24, %v6846_v53  ;;  %v4278_v21 = vadd.f32 %v4277_v37, %v4276_v39 }
 0x457   : > { %3859 = vst.msk [vmem:[%s6851_s10 + $0x80] sm:$0xff] %vm3842_vm2, %v3780_v48  ;;  %v3783_v11 = vadd.f32 %v4278_v21, %v6846_v53 }
 0x459   : > { %3860 = vst.msk [vmem:[%s6851_s10 + $0x88] sm:$0xff] %vm3842_vm2, %v3783_v11  ;;  %v4279_v16 = vpop.f32.mrb[132].mxu1 }
 0x45a   : > { %v4280_v47 = vpop.f32.mrb[133].mxu1 }
 0x45b   : > { %v4281_v22 = vadd.f32 %v4280_v47, %v4279_v16  ;;  %v4282_v49 = vpop.f32.mrb[134].mxu1 }
 0x45c   : > { %v4283_v31 = vpop.f32.mrb[135].mxu1 }
 0x45d   : > { %v3788_v59 = vadd.f32 %v4281_v22, %v6846_v53  ;;  %v4284_v45 = vadd.f32 %v4283_v31, %v4282_v49 }
 0x45f   : > { %3861 = vst.msk [vmem:[%s6851_s10 + $0x90] sm:$0xff] %vm3842_vm2, %v3788_v59  ;;  %v3791_v6 = vadd.f32 %v4284_v45, %v6846_v53 }
 0x461   : > { %3862 = vst.msk [vmem:[%s6851_s10 + $0x98] sm:$0xff] %vm3842_vm2, %v3791_v6  ;;  %v4285_v12 = vpop.f32.mrb[136].mxu1 }
 0x462   : > { %v4286_v51 = vpop.f32.mrb[137].mxu1 }
 0x463   : > { %v4287_v62 = vadd.f32 %v4286_v51, %v4285_v12  ;;  %v4288_v29 = vpop.f32.mrb[138].mxu1 }
 0x464   : > { %v4289_v5 = vpop.f32.mrb[139].mxu1 }
 0x465   : > { %v3796_v61 = vadd.f32 %v4287_v62, %v6846_v53  ;;  %v4290_v41 = vadd.f32 %v4289_v5, %v4288_v29 }
 0x467   : > { %3863 = vst.msk [vmem:[%s6851_s10 + $0xa0] sm:$0xff] %vm3842_vm2, %v3796_v61  ;;  %v3799_v35 = vadd.f32 %v4290_v41, %v6846_v53 }
 0x469   : > { %3864 = vst.msk [vmem:[%s6851_s10 + $0xa8] sm:$0xff] %vm3842_vm2, %v3799_v35  ;;  %v4291_v63 = vpop.f32.mrb[140].mxu1 }
 0x46a   : > { %v4292_v34 = vpop.f32.mrb[141].mxu1 }
 0x46b   : > { %v4293_v23 = vadd.f32 %v4292_v34, %v4291_v63  ;;  %v4294_v14 = vpop.f32.mrb[142].mxu1 }
 0x46c   : > { %v4295_v7 = vpop.f32.mrb[143].mxu1 }
 0x46d   : > { %v3804_v43 = vadd.f32 %v4293_v23, %v6846_v53  ;;  %v4296_v44 = vadd.f32 %v4295_v7, %v4294_v14 }
 0x46f   : > { %3865 = vst.msk [vmem:[%s6851_s10 + $0xb0] sm:$0xff] %vm3842_vm2, %v3804_v43  ;;  %v3807_v8 = vadd.f32 %v4296_v44, %v6846_v53 }
 0x471   : > { %3866 = vst.msk [vmem:[%s6851_s10 + $0xb8] sm:$0xff] %vm3842_vm2, %v3807_v8  ;;  %v4297_v55 = vpop.f32.mrb[144].mxu1 }
 0x472   : > { %v4298_v3 = vpop.f32.mrb[145].mxu1 }
 0x473   : > { %v4299_v40 = vadd.f32 %v4298_v3, %v4297_v55  ;;  %v4300_v19 = vpop.f32.mrb[146].mxu1 }
 0x474   : > { %v4301_v25 = vpop.f32.mrb[147].mxu1 }
 0x475   : > { %v3812_v27 = vadd.f32 %v4299_v40, %v6846_v53  ;;  %v4302_v56 = vadd.f32 %v4301_v25, %v4300_v19 }
 0x477   : > { %3867 = vst.msk [vmem:[%s6851_s10 + $0xc0] sm:$0xff] %vm3842_vm2, %v3812_v27  ;;  %v3815_v58 = vadd.f32 %v4302_v56, %v6846_v53 }
 0x479   : > { %3868 = vst.msk [vmem:[%s6851_s10 + $0xc8] sm:$0xff] %vm3842_vm2, %v3815_v58  ;;  %v4303_v26 = vpop.f32.mrb[148].mxu1 }
 0x47a   : > { %v4304_v15 = vpop.f32.mrb[149].mxu1 }
 0x47b   : > { %v4305_v42 = vadd.f32 %v4304_v15, %v4303_v26  ;;  %v4306_v38 = vpop.f32.mrb[150].mxu1 }
 0x47c   : > { %v4307_v33 = vpop.f32.mrb[151].mxu1 }
 0x47d   : > { %v3820_v30 = vadd.f32 %v4305_v42, %v6846_v53  ;;  %v4308_v18 = vadd.f32 %v4307_v33, %v4306_v38 }
 0x47f   : > { %3869 = vst.msk [vmem:[%s6851_s10 + $0xd0] sm:$0xff] %vm3842_vm2, %v3820_v30  ;;  %v3823_v32 = vadd.f32 %v4308_v18, %v6846_v53 }
 0x481   : > { %3870 = vst.msk [vmem:[%s6851_s10 + $0xd8] sm:$0xff] %vm3842_vm2, %v3823_v32  ;;  %v4309_v46 = vpop.f32.mrb[152].mxu1 }
 0x482   : > { %v4310_v50 = vpop.f32.mrb[153].mxu1 }
 0x483   : > { %v4311_v57 = vadd.f32 %v4310_v50, %v4309_v46  ;;  %v4312_v28 = vpop.f32.mrb[154].mxu1 }
 0x484   : > { %v4313_v1 = vpop.f32.mrb[155].mxu1 }
 0x485   : > { %v3828_v9 = vadd.f32 %v4311_v57, %v6846_v53  ;;  %v4314_v20 = vadd.f32 %v4313_v1, %v4312_v28 }
 0x487   : > { %3871 = vst.msk [vmem:[%s6851_s10 + $0xe0] sm:$0xff] %vm3842_vm2, %v3828_v9  ;;  %v3831_v54 = vadd.f32 %v4314_v20, %v6846_v53 }
 0x489   : > { %3872 = vst.msk [vmem:[%s6851_s10 + $0xe8] sm:$0xff] %vm3842_vm2, %v3831_v54  ;;  %v4315_v0 = vpop.f32.mrb[156].mxu1 }
 0x48a   : > { %v4316_v60 = vpop.f32.mrb[157].mxu1 }
 0x48b   : > { %v4317_v52 = vadd.f32 %v4316_v60, %v4315_v0  ;;  %v4318_v10 = vpop.f32.mrb[158].mxu1 }
 0x48c   : > { %v4319_v4 = vpop.f32.mrb[159].mxu1 }
 0x48d   : > { %v3836_v2 = vadd.f32 %v4317_v52, %v6846_v53  ;;  %v4320_v36 = vadd.f32 %v4319_v4, %v4318_v10 }
 0x48f   : > { %3873 = vst.msk [vmem:[%s6851_s10 + $0xf0] sm:$0xff] %vm3842_vm2, %v3836_v2  ;;  %v3839_v17 = vadd.f32 %v4320_v36, %v6846_v53 }
 0x491   : > { %3874 = vst.msk [vmem:[%s6851_s10 + $0xf8] sm:$0xff] %vm3842_vm2, %v3839_v17 }
 0x492 PF: > { %s17_s24 = sadd.s32 1, %s5219_s24  }
 0x493   : > { %p14_p4 = scmp.ge.s32.totalorder %s17_s24, 4  }
 0x495   :  { %16 = sbr.rel (!%p14_p4) target bundleno = 1 (0x1), region = 78 }

</bundles_post_ra>
